<compile_context>
chip_gen: v7x
topology: tpu7x:2x2x1
jax: 0.10.0
libtpu: 0.0.40
codegen_flags: <defaults>
</compile_context>

<pallas_src>
import numpy as np
import jax
import jax.numpy as jnp
from jax.experimental import pallas as pl
from jax.experimental.pallas import tpu as pltpu

BN_EPS = 1e-5
LRELU_SLOPE = 0.2
K = 4            # conv kernel size for every layer
LANES = 128      # every activation/weight tile is 128 lanes wide (= W*C)
DATA_OFF = 8     # row offset of h=0 inside each per-image padded row block

# (H_in, C_in(lane-padded), C_out, OH) for the three stride-2 / pad-1 convs
LAYERS = [(32, 4, 8, 16), (16, 8, 16, 8), (8, 16, 32, 4)]


def _round_up(x, m):
    return (x + m - 1) // m * m


def _block_rows(h_in):
    # per-image block: row DATA_OFF-1 = top zero pad, DATA_OFF..DATA_OFF+h_in-1
    # = data, DATA_OFF+h_in = bottom zero pad, rest zero (8-aligned block).
    return _round_up(DATA_OFF + h_in + 1, 8)


BLK = [_block_rows(h) for (h, _, _, _) in LAYERS]      # [48, 32, 24]
POOL_OFF = [0, LANES, 2 * LANES]                       # pooling-matrix rows in cpack
GB_OFF = 3 * LANES                                     # gamma/beta rows in cpack
D4_OFF = GB_OFF + 8                                    # head weight rows (8-aligned)


# ------------------------------ Pallas kernel ------------------------------ #
def _make_kernel(n):
    def kernel(x0_ref, d_ref, c_ref, o_ref, buf2_ref, buf3_ref):
        # Zero-init scratch so the H zero-pad rows are valid before any read.
        buf2_ref[...] = jnp.zeros_like(buf2_ref)
        buf3_ref[...] = jnp.zeros_like(buf3_ref)

        def conv(src_ref, layer, blk, oh):
            # sum_kh  (strided tap read over all images) @ D[layer, kh]
            acc = jnp.zeros((n * oh, LANES), jnp.float32)
            for kh in range(K):
                taps = [src_ref[pl.ds(b * blk + DATA_OFF - 1 + kh, oh, stride=2), :]
                        for b in range(n)]
                t = jnp.concatenate(taps, axis=0).astype(jnp.bfloat16)
                acc = acc + jnp.dot(t, d_ref[K * layer + kh],
                                    preferred_element_type=jnp.float32)
            return acc

        def bn_lrelu(y, layer):
            # Training-mode BatchNorm (batch stats, biased var) + LeakyReLU(0.2).
            # One fused stats matmul: [colsum(y); colsum(y*y)] @ pool.
            pool = c_ref[pl.ds(POOL_OFF[layer], LANES), :]
            s = jnp.concatenate(
                [jnp.sum(y, axis=0, keepdims=True),
                 jnp.sum(y * y, axis=0, keepdims=True)], axis=0)        # (2,128)
            stats = jnp.dot(s, pool, preferred_element_type=jnp.float32)
            mean = stats[0:1, :]
            var = jnp.maximum(stats[1:2, :] - mean * mean, 0.0)
            gamma = c_ref[pl.ds(GB_OFF + 2 * layer, 1), :]
            beta = c_ref[pl.ds(GB_OFF + 2 * layer + 1, 1), :]
            scale = gamma * jax.lax.rsqrt(var + BN_EPS)
            shift = beta - mean * scale
            z = y * scale + shift
            return jnp.where(z >= 0.0, z, LRELU_SLOPE * z)

        def store(dst_ref, z, blk, rows):
            # Write each image's rows into its zero-padded block (8-aligned).
            for b in range(n):
                dst_ref[pl.ds(b * blk + DATA_OFF, rows), :] = \
                    z[b * rows:(b + 1) * rows, :]

        # conv1 -> BN -> LReLU                                  (N*16, 128)
        z1 = bn_lrelu(conv(x0_ref, 0, BLK[0], 16), 0)
        store(buf2_ref, z1, BLK[1], 16)
        # conv2 -> BN -> LReLU                                  (N*8, 128)
        z2 = bn_lrelu(conv(buf2_ref, 1, BLK[1], 8), 1)
        store(buf3_ref, z2, BLK[2], 8)
        # conv3 -> BN -> LReLU                                  (N*4, 128)
        z3 = bn_lrelu(conv(buf3_ref, 2, BLK[2], 4), 2)

        # Conv2d(32, 1, 4, 1, 0) + Sigmoid: full 4x4x32 contraction per image
        # as an elementwise multiply + full reduce (no matmul needed, oh=1).
        d4 = c_ref[pl.ds(D4_OFF, K), :]                                 # (4,128)
        logits = jnp.concatenate(
            [jnp.sum(z3[b * 4:(b + 1) * 4, :] * d4, keepdims=True)
             for b in range(n)], axis=0)                                # (n,1)
        o_ref[...] = jax.nn.sigmoid(logits)

    return kernel


# -------------------------- trace-time constants ---------------------------- #
def _col_select(w_in, ow, stride, pad):
    s = np.zeros((w_in, ow, K), np.float32)
    for kw in range(K):
        for o in range(ow):
            w = stride * o + kw - pad
            if 0 <= w < w_in:
                s[w, o, kw] = 1.0
    return s


def _width_weight(w_oihw, w_in, ow, stride, pad):
    # D[kh, (w, cin), (ow, cout)] = sum_kw [w == stride*ow+kw-pad] * W[cout,cin,kh,kw]
    s = _col_select(w_in, ow, stride, pad)                   # (w_in, ow, K)
    cout, cin = w_oihw.shape[0], w_oihw.shape[1]
    d = jnp.einsum('aok,uiyk->yaiou', s, w_oihw)             # (K, w_in, cin, ow, cout)
    return d.reshape(K, w_in * cin, ow * cout)


def _channel_pool(ow, c, count):
    # colsum(y) @ pool = per-channel mean broadcast back over the (ow, c) lanes
    return np.kron(np.ones((ow, ow), np.float32),
                   np.eye(c, dtype=np.float32)) / float(count)


# --------------------------------- forward ---------------------------------- #
def init_params(key):
    # Conv2d weights (Cout, Cin, 4, 4); BatchNorm gamma=1 / beta=0 (PyTorch defaults).
    ks = jax.random.split(key, 4)
    shapes = [(8, 3, 4, 4), (16, 8, 4, 4), (32, 16, 4, 4), (1, 32, 4, 4)]
    ws = [0.02 * jax.random.normal(k, s, jnp.float32) for k, s in zip(ks, shapes)]
    blocks = [(ws[0], jnp.ones((8,), jnp.float32), jnp.zeros((8,), jnp.float32)),
              (ws[1], jnp.ones((16,), jnp.float32), jnp.zeros((16,), jnp.float32)),
              (ws[2], jnp.ones((32,), jnp.float32), jnp.zeros((32,), jnp.float32))]
    return {"blocks": blocks, "w4": ws[3]}


def discriminator_forward(img, params):
    n, cin, h, w = img.shape
    assert (cin, h, w) == (3, 32, 32)

    # Input in lane-dense padded layout: rows = (n, h_padded), lanes = (w, c)=128,
    # with Cin padded 3 -> 4 (zero channel) and each image's H zero-padded.
    xp = jnp.pad(img, ((0, 0), (0, 1), (0, 0), (0, 0)))           # (n, 4, 32, 32)
    xp = xp.transpose(0, 2, 3, 1).reshape(n, 32, LANES)           # (n, 32, 128)
    x0 = jnp.zeros((n, BLK[0], LANES), jnp.float32)
    x0 = x0.at[:, DATA_OFF:DATA_OFF + 32, :].set(xp).reshape(n * BLK[0], LANES)

    # Packed bf16 conv weights: dpack[4*l + kh] is the (128, 128) width-folded tap.
    w1p = jnp.pad(params["blocks"][0][0], ((0, 0), (0, 1), (0, 0), (0, 0)))
    ws = [w1p, params["blocks"][1][0], params["blocks"][2][0]]
    dpack = jnp.concatenate(
        [_width_weight(wl, hin, oh, 2, 1)
         for wl, (hin, ci, co, oh) in zip(ws, LAYERS)],
        axis=0).astype(jnp.bfloat16)                              # (12, 128, 128)

    # Packed f32 constants: 3 BN pooling matrices, gamma/beta rows, head weights.
    rows = [jnp.asarray(_channel_pool(oh, co, n * oh * oh))
            for (_, _, co, oh) in LAYERS]                         # 3 x (128, 128)
    for (_, g, b), (_, _, co, oh) in zip(params["blocks"], LAYERS):
        rows.append(jnp.tile(g, oh)[None, :])
        rows.append(jnp.tile(b, oh)[None, :])
    rows.append(jnp.zeros((D4_OFF - GB_OFF - 6, LANES), jnp.float32))   # align head
    rows.append(params["w4"][0].transpose(1, 2, 0).reshape(K, LANES))   # d4 (4,128)
    cpack = jnp.concatenate(rows, axis=0)                         # (396, 128)
    assert cpack.shape == (D4_OFF + K, LANES)

    vmem = pl.BlockSpec(memory_space=pltpu.MemorySpace.VMEM)
    out = pl.pallas_call(
        _make_kernel(n),
        out_shape=jax.ShapeDtypeStruct((n, 1), jnp.float32),
        in_specs=[vmem, vmem, vmem],
        out_specs=vmem,
        scratch_shapes=[pltpu.VMEM((n * BLK[1], LANES), jnp.float32),
                        pltpu.VMEM((n * BLK[2], LANES), jnp.float32)],
    )(x0, dpack, cpack)
    return out.reshape(n, 1, 1, 1)


# ---------------------------- pure-JAX reference ----------------------------- #
def _reference_forward(x, params):
    def conv(x, w, stride, pad):
        return jax.lax.conv_general_dilated(
            x, w, (stride, stride), [(pad, pad), (pad, pad)],
            dimension_numbers=("NCHW", "OIHW", "NCHW"))

    for (w, g, b) in params["blocks"]:
        y = conv(x, w, 2, 1)
        mean = jnp.mean(y, axis=(0, 2, 3), keepdims=True)
        var = jnp.mean((y - mean) ** 2, axis=(0, 2, 3), keepdims=True)
        y = (y - mean) * jax.lax.rsqrt(var + BN_EPS)
        y = y * g.reshape(1, -1, 1, 1) + b.reshape(1, -1, 1, 1)
        x = jnp.where(y >= 0.0, y, LRELU_SLOPE * y)
    y = conv(x, params["w4"], 1, 0)
    return jax.nn.sigmoid(y)


if __name__ == "__main__":
    key = jax.random.PRNGKey(0)
    k_img, k_par = jax.random.split(key)
    # DCGAN-style 32x32 RGB input -> (N, 1, 1, 1) output
    img = jax.random.normal(k_img, (2, 3, 32, 32), jnp.float32)
    params = init_params(k_par)

    fwd = jax.jit(discriminator_forward)
    out = jax.block_until_ready(fwd(img, params))
    ref = jax.block_until_ready(_reference_forward(img, params))

    assert out.shape == (2, 1, 1, 1), out.shape
    # Tolerance loosened vs the pure-f32 version: conv MXU operands are bf16
    # (f32 accumulation), as recommended by the performance review.
    if not jnp.allclose(out, ref, atol=2e-2, rtol=2e-2):
        raise AssertionError("Pallas output does not match JAX reference")
    print("KERNEL_OK")
</pallas_src>

<mosaic_0001>
module attributes {stable_mosaic.version = 11 : i64} {
  func.func @kernel(%arg0: memref<96x128xf32, #tpu.memory_space<vmem>>, %arg1: memref<12x128x128xbf16, #tpu.memory_space<vmem>>, %arg2: memref<396x128xf32, #tpu.memory_space<vmem>>, %arg3: memref<2x1xf32, #tpu.memory_space<vmem>>, %arg4: memref<64x128xf32, #tpu.memory_space<vmem>>, %arg5: memref<48x128xf32, #tpu.memory_space<vmem>>) attributes {dimension_semantics = [], scalar_prefetch = 0 : i64, scratch_operands = 2 : i64, tpu.core_type = #tpu.core_type<tc>} {
    %cst = arith.constant 0.000000e+00 : f32
    %0 = vector.broadcast %cst : f32 to vector<64x128xf32>
    %c0 = arith.constant 0 : index
    %c0_0 = arith.constant 0 : index
    %1 = vector.load %arg4[%c0, %c0_0] : memref<64x128xf32, #tpu.memory_space<vmem>>, vector<64x128xf32>
    tpu.vector_store %arg4[%c0, %c0_0], %0 {strides = array<i32>} : memref<64x128xf32, #tpu.memory_space<vmem>>, vector<64x128xf32>,
    %cst_1 = arith.constant 0.000000e+00 : f32
    %2 = vector.broadcast %cst_1 : f32 to vector<48x128xf32>
    %c0_2 = arith.constant 0 : index
    %c0_3 = arith.constant 0 : index
    %3 = vector.load %arg5[%c0_2, %c0_3] : memref<48x128xf32, #tpu.memory_space<vmem>>, vector<48x128xf32>
    tpu.vector_store %arg5[%c0_2, %c0_3], %2 {strides = array<i32>} : memref<48x128xf32, #tpu.memory_space<vmem>>, vector<48x128xf32>,
    %cst_4 = arith.constant 0.000000e+00 : f32
    %4 = vector.broadcast %cst_4 : f32 to vector<32x128xf32>
    %c7 = arith.constant 7 : index
    %c0_5 = arith.constant 0 : index
    %5 = tpu.strided_load %arg0[%c7, %c0_5] {strides = array<i32: 2, 1>} : memref<96x128xf32, #tpu.memory_space<vmem>>, vector<16x128xf32>
    %c55 = arith.constant 55 : index
    %c0_6 = arith.constant 0 : index
    %6 = tpu.strided_load %arg0[%c55, %c0_6] {strides = array<i32: 2, 1>} : memref<96x128xf32, #tpu.memory_space<vmem>>, vector<16x128xf32>
    %7 = tpu.concatenate %5, %6 in 0 : vector<16x128xf32>, vector<16x128xf32> -> vector<32x128xf32>
    %8 = arith.truncf %7 : vector<32x128xf32> to vector<32x128xbf16>
    %c0_7 = arith.constant 0 : index
    %c0_8 = arith.constant 0 : index
    %c0_9 = arith.constant 0 : index
    %9 = vector.load %arg1[%c0_7, %c0_8, %c0_9] : memref<12x128x128xbf16, #tpu.memory_space<vmem>>, vector<1x128x128xbf16>
    %10 = vector.shape_cast %9 : vector<1x128x128xbf16> to vector<128x128xbf16>
    %cst_10 = arith.constant dense<0.000000e+00> : vector<32x128xf32>
    %11 = tpu.matmul %8, %10, %cst_10 {dimension_numbers = #tpu.dot_dimension_numbers<[1], [0], [0], [1], [0, 0, 1, 1], [], []>} : vector<32x128xbf16>, vector<128x128xbf16>, vector<32x128xf32> -> vector<32x128xf32>
    %12 = arith.addf %4, %11 : vector<32x128xf32>
    %c8 = arith.constant 8 : index
    %c0_11 = arith.constant 0 : index
    %13 = tpu.strided_load %arg0[%c8, %c0_11] {strides = array<i32: 2, 1>} : memref<96x128xf32, #tpu.memory_space<vmem>>, vector<16x128xf32>
    %c56 = arith.constant 56 : index
    %c0_12 = arith.constant 0 : index
    %14 = tpu.strided_load %arg0[%c56, %c0_12] {strides = array<i32: 2, 1>} : memref<96x128xf32, #tpu.memory_space<vmem>>, vector<16x128xf32>
    %15 = tpu.concatenate %13, %14 in 0 : vector<16x128xf32>, vector<16x128xf32> -> vector<32x128xf32>
    %16 = arith.truncf %15 : vector<32x128xf32> to vector<32x128xbf16>
    %c1 = arith.constant 1 : index
    %c0_13 = arith.constant 0 : index
    %c0_14 = arith.constant 0 : index
    %17 = vector.load %arg1[%c1, %c0_13, %c0_14] : memref<12x128x128xbf16, #tpu.memory_space<vmem>>, vector<1x128x128xbf16>
    %18 = vector.shape_cast %17 : vector<1x128x128xbf16> to vector<128x128xbf16>
    %cst_15 = arith.constant dense<0.000000e+00> : vector<32x128xf32>
    %19 = tpu.matmul %16, %18, %cst_15 {dimension_numbers = #tpu.dot_dimension_numbers<[1], [0], [0], [1], [0, 0, 1, 1], [], []>} : vector<32x128xbf16>, vector<128x128xbf16>, vector<32x128xf32> -> vector<32x128xf32>
    %20 = arith.addf %12, %19 : vector<32x128xf32>
    %c9 = arith.constant 9 : index
    %c0_16 = arith.constant 0 : index
    %21 = tpu.strided_load %arg0[%c9, %c0_16] {strides = array<i32: 2, 1>} : memref<96x128xf32, #tpu.memory_space<vmem>>, vector<16x128xf32>
    %c57 = arith.constant 57 : index
    %c0_17 = arith.constant 0 : index
    %22 = tpu.strided_load %arg0[%c57, %c0_17] {strides = array<i32: 2, 1>} : memref<96x128xf32, #tpu.memory_space<vmem>>, vector<16x128xf32>
    %23 = tpu.concatenate %21, %22 in 0 : vector<16x128xf32>, vector<16x128xf32> -> vector<32x128xf32>
    %24 = arith.truncf %23 : vector<32x128xf32> to vector<32x128xbf16>
    %c2 = arith.constant 2 : index
    %c0_18 = arith.constant 0 : index
    %c0_19 = arith.constant 0 : index
    %25 = vector.load %arg1[%c2, %c0_18, %c0_19] : memref<12x128x128xbf16, #tpu.memory_space<vmem>>, vector<1x128x128xbf16>
    %26 = vector.shape_cast %25 : vector<1x128x128xbf16> to vector<128x128xbf16>
    %cst_20 = arith.constant dense<0.000000e+00> : vector<32x128xf32>
    %27 = tpu.matmul %24, %26, %cst_20 {dimension_numbers = #tpu.dot_dimension_numbers<[1], [0], [0], [1], [0, 0, 1, 1], [], []>} : vector<32x128xbf16>, vector<128x128xbf16>, vector<32x128xf32> -> vector<32x128xf32>
    %28 = arith.addf %20, %27 : vector<32x128xf32>
    %c10 = arith.constant 10 : index
    %c0_21 = arith.constant 0 : index
    %29 = tpu.strided_load %arg0[%c10, %c0_21] {strides = array<i32: 2, 1>} : memref<96x128xf32, #tpu.memory_space<vmem>>, vector<16x128xf32>
    %c58 = arith.constant 58 : index
    %c0_22 = arith.constant 0 : index
    %30 = tpu.strided_load %arg0[%c58, %c0_22] {strides = array<i32: 2, 1>} : memref<96x128xf32, #tpu.memory_space<vmem>>, vector<16x128xf32>
    %31 = tpu.concatenate %29, %30 in 0 : vector<16x128xf32>, vector<16x128xf32> -> vector<32x128xf32>
    %32 = arith.truncf %31 : vector<32x128xf32> to vector<32x128xbf16>
    %c3 = arith.constant 3 : index
    %c0_23 = arith.constant 0 : index
    %c0_24 = arith.constant 0 : index
    %33 = vector.load %arg1[%c3, %c0_23, %c0_24] : memref<12x128x128xbf16, #tpu.memory_space<vmem>>, vector<1x128x128xbf16>
    %34 = vector.shape_cast %33 : vector<1x128x128xbf16> to vector<128x128xbf16>
    %cst_25 = arith.constant dense<0.000000e+00> : vector<32x128xf32>
    %35 = tpu.matmul %32, %34, %cst_25 {dimension_numbers = #tpu.dot_dimension_numbers<[1], [0], [0], [1], [0, 0, 1, 1], [], []>} : vector<32x128xbf16>, vector<128x128xbf16>, vector<32x128xf32> -> vector<32x128xf32>
    %36 = arith.addf %28, %35 : vector<32x128xf32>
    %c0_26 = arith.constant 0 : index
    %c0_27 = arith.constant 0 : index
    %37 = vector.load %arg2[%c0_26, %c0_27] : memref<396x128xf32, #tpu.memory_space<vmem>>, vector<128x128xf32>
    %cst_28 = arith.constant dense<0.000000e+00> : vector<128xf32>
    %38 = vector.multi_reduction <add>, %36, %cst_28 [0] : vector<32x128xf32> to vector<128xf32>
    %39 = vector.shape_cast %38 : vector<128xf32> to vector<1x128xf32>
    %40 = arith.mulf %36, %36 : vector<32x128xf32>
    %cst_29 = arith.constant dense<0.000000e+00> : vector<128xf32>
    %41 = vector.multi_reduction <add>, %40, %cst_29 [0] : vector<32x128xf32> to vector<128xf32>
    %42 = vector.shape_cast %41 : vector<128xf32> to vector<1x128xf32>
    %43 = tpu.concatenate %39, %42 in 0 : vector<1x128xf32>, vector<1x128xf32> -> vector<2x128xf32>
    %cst_30 = arith.constant dense<0.000000e+00> : vector<2x128xf32>
    %44 = tpu.matmul %43, %37, %cst_30 {dimension_numbers = #tpu.dot_dimension_numbers<[1], [0], [0], [1], [0, 0, 1, 1], [], []>} : vector<2x128xf32>, vector<128x128xf32>, vector<2x128xf32> -> vector<2x128xf32>
    %45 = vector.extract_strided_slice %44 {offsets = [0, 0], sizes = [1, 128], strides = [1, 1]} : vector<2x128xf32> to vector<1x128xf32>
    %46 = vector.extract_strided_slice %44 {offsets = [1, 0], sizes = [1, 128], strides = [1, 1]} : vector<2x128xf32> to vector<1x128xf32>
    %47 = arith.mulf %45, %45 : vector<1x128xf32>
    %48 = arith.subf %46, %47 : vector<1x128xf32>
    %cst_31 = arith.constant 0.000000e+00 : f32
    %49 = vector.broadcast %cst_31 : f32 to vector<1x128xf32>
    %50 = arith.maximumf %48, %49 : vector<1x128xf32>
    %c384 = arith.constant 384 : index
    %c0_32 = arith.constant 0 : index
    %51 = vector.load %arg2[%c384, %c0_32] : memref<396x128xf32, #tpu.memory_space<vmem>>, vector<1x128xf32>
    %c385 = arith.constant 385 : index
    %c0_33 = arith.constant 0 : index
    %52 = vector.load %arg2[%c385, %c0_33] : memref<396x128xf32, #tpu.memory_space<vmem>>, vector<1x128xf32>
    %cst_34 = arith.constant 9.99999974E-6 : f32
    %53 = vector.broadcast %cst_34 : f32 to vector<1x128xf32>
    %54 = arith.addf %50, %53 : vector<1x128xf32>
    %55 = math.rsqrt %54 : vector<1x128xf32>
    %56 = arith.mulf %51, %55 : vector<1x128xf32>
    %57 = arith.mulf %45, %56 : vector<1x128xf32>
    %58 = arith.subf %52, %57 : vector<1x128xf32>
    %59 = vector.broadcast %56 : vector<1x128xf32> to vector<32x128xf32>
    %60 = arith.mulf %36, %59 : vector<32x128xf32>
    %61 = vector.broadcast %58 : vector<1x128xf32> to vector<32x128xf32>
    %62 = arith.addf %60, %61 : vector<32x128xf32>
    %cst_35 = arith.constant 0.000000e+00 : f32
    %63 = vector.broadcast %cst_35 : f32 to vector<32x128xf32>
    %64 = arith.cmpf oge, %62, %63 : vector<32x128xf32>
    %cst_36 = arith.constant 2.000000e-01 : f32
    %65 = vector.broadcast %cst_36 : f32 to vector<32x128xf32>
    %66 = arith.mulf %65, %62 : vector<32x128xf32>
    %67 = arith.select %64, %62, %66 : vector<32x128xi1>, vector<32x128xf32>
    %68 = vector.extract_strided_slice %67 {offsets = [0, 0], sizes = [16, 128], strides = [1, 1]} : vector<32x128xf32> to vector<16x128xf32>
    %c8_37 = arith.constant 8 : index
    %c0_38 = arith.constant 0 : index
    %69 = vector.load %arg4[%c8_37, %c0_38] : memref<64x128xf32, #tpu.memory_space<vmem>>, vector<16x128xf32>
    tpu.vector_store %arg4[%c8_37, %c0_38], %68 {strides = array<i32>} : memref<64x128xf32, #tpu.memory_space<vmem>>, vector<16x128xf32>,
    %70 = vector.extract_strided_slice %67 {offsets = [16, 0], sizes = [16, 128], strides = [1, 1]} : vector<32x128xf32> to vector<16x128xf32>
    %c40 = arith.constant 40 : index
    %c0_39 = arith.constant 0 : index
    %71 = vector.load %arg4[%c40, %c0_39] : memref<64x128xf32, #tpu.memory_space<vmem>>, vector<16x128xf32>
    tpu.vector_store %arg4[%c40, %c0_39], %70 {strides = array<i32>} : memref<64x128xf32, #tpu.memory_space<vmem>>, vector<16x128xf32>,
    %cst_40 = arith.constant 0.000000e+00 : f32
    %72 = vector.broadcast %cst_40 : f32 to vector<16x128xf32>
    %c7_41 = arith.constant 7 : index
    %c0_42 = arith.constant 0 : index
    %73 = tpu.strided_load %arg4[%c7_41, %c0_42] {strides = array<i32: 2, 1>} : memref<64x128xf32, #tpu.memory_space<vmem>>, vector<8x128xf32>
    %c39 = arith.constant 39 : index
    %c0_43 = arith.constant 0 : index
    %74 = tpu.strided_load %arg4[%c39, %c0_43] {strides = array<i32: 2, 1>} : memref<64x128xf32, #tpu.memory_space<vmem>>, vector<8x128xf32>
    %75 = tpu.concatenate %73, %74 in 0 : vector<8x128xf32>, vector<8x128xf32> -> vector<16x128xf32>
    %76 = arith.truncf %75 : vector<16x128xf32> to vector<16x128xbf16>
    %c4 = arith.constant 4 : index
    %c0_44 = arith.constant 0 : index
    %c0_45 = arith.constant 0 : index
    %77 = vector.load %arg1[%c4, %c0_44, %c0_45] : memref<12x128x128xbf16, #tpu.memory_space<vmem>>, vector<1x128x128xbf16>
    %78 = vector.shape_cast %77 : vector<1x128x128xbf16> to vector<128x128xbf16>
    %cst_46 = arith.constant dense<0.000000e+00> : vector<16x128xf32>
    %79 = tpu.matmul %76, %78, %cst_46 {dimension_numbers = #tpu.dot_dimension_numbers<[1], [0], [0], [1], [0, 0, 1, 1], [], []>} : vector<16x128xbf16>, vector<128x128xbf16>, vector<16x128xf32> -> vector<16x128xf32>
    %80 = arith.addf %72, %79 : vector<16x128xf32>
    %c8_47 = arith.constant 8 : index
    %c0_48 = arith.constant 0 : index
    %81 = tpu.strided_load %arg4[%c8_47, %c0_48] {strides = array<i32: 2, 1>} : memref<64x128xf32, #tpu.memory_space<vmem>>, vector<8x128xf32>
    %c40_49 = arith.constant 40 : index
    %c0_50 = arith.constant 0 : index
    %82 = tpu.strided_load %arg4[%c40_49, %c0_50] {strides = array<i32: 2, 1>} : memref<64x128xf32, #tpu.memory_space<vmem>>, vector<8x128xf32>
    %83 = tpu.concatenate %81, %82 in 0 : vector<8x128xf32>, vector<8x128xf32> -> vector<16x128xf32>
    %84 = arith.truncf %83 : vector<16x128xf32> to vector<16x128xbf16>
    %c5 = arith.constant 5 : index
    %c0_51 = arith.constant 0 : index
    %c0_52 = arith.constant 0 : index
    %85 = vector.load %arg1[%c5, %c0_51, %c0_52] : memref<12x128x128xbf16, #tpu.memory_space<vmem>>, vector<1x128x128xbf16>
    %86 = vector.shape_cast %85 : vector<1x128x128xbf16> to vector<128x128xbf16>
    %cst_53 = arith.constant dense<0.000000e+00> : vector<16x128xf32>
    %87 = tpu.matmul %84, %86, %cst_53 {dimension_numbers = #tpu.dot_dimension_numbers<[1], [0], [0], [1], [0, 0, 1, 1], [], []>} : vector<16x128xbf16>, vector<128x128xbf16>, vector<16x128xf32> -> vector<16x128xf32>
    %88 = arith.addf %80, %87 : vector<16x128xf32>
    %c9_54 = arith.constant 9 : index
    %c0_55 = arith.constant 0 : index
    %89 = tpu.strided_load %arg4[%c9_54, %c0_55] {strides = array<i32: 2, 1>} : memref<64x128xf32, #tpu.memory_space<vmem>>, vector<8x128xf32>
    %c41 = arith.constant 41 : index
    %c0_56 = arith.constant 0 : index
    %90 = tpu.strided_load %arg4[%c41, %c0_56] {strides = array<i32: 2, 1>} : memref<64x128xf32, #tpu.memory_space<vmem>>, vector<8x128xf32>
    %91 = tpu.concatenate %89, %90 in 0 : vector<8x128xf32>, vector<8x128xf32> -> vector<16x128xf32>
    %92 = arith.truncf %91 : vector<16x128xf32> to vector<16x128xbf16>
    %c6 = arith.constant 6 : index
    %c0_57 = arith.constant 0 : index
    %c0_58 = arith.constant 0 : index
    %93 = vector.load %arg1[%c6, %c0_57, %c0_58] : memref<12x128x128xbf16, #tpu.memory_space<vmem>>, vector<1x128x128xbf16>
    %94 = vector.shape_cast %93 : vector<1x128x128xbf16> to vector<128x128xbf16>
    %cst_59 = arith.constant dense<0.000000e+00> : vector<16x128xf32>
    %95 = tpu.matmul %92, %94, %cst_59 {dimension_numbers = #tpu.dot_dimension_numbers<[1], [0], [0], [1], [0, 0, 1, 1], [], []>} : vector<16x128xbf16>, vector<128x128xbf16>, vector<16x128xf32> -> vector<16x128xf32>
    %96 = arith.addf %88, %95 : vector<16x128xf32>
    %c10_60 = arith.constant 10 : index
    %c0_61 = arith.constant 0 : index
    %97 = tpu.strided_load %arg4[%c10_60, %c0_61] {strides = array<i32: 2, 1>} : memref<64x128xf32, #tpu.memory_space<vmem>>, vector<8x128xf32>
    %c42 = arith.constant 42 : index
    %c0_62 = arith.constant 0 : index
    %98 = tpu.strided_load %arg4[%c42, %c0_62] {strides = array<i32: 2, 1>} : memref<64x128xf32, #tpu.memory_space<vmem>>, vector<8x128xf32>
    %99 = tpu.concatenate %97, %98 in 0 : vector<8x128xf32>, vector<8x128xf32> -> vector<16x128xf32>
    %100 = arith.truncf %99 : vector<16x128xf32> to vector<16x128xbf16>
    %c7_63 = arith.constant 7 : index
    %c0_64 = arith.constant 0 : index
    %c0_65 = arith.constant 0 : index
    %101 = vector.load %arg1[%c7_63, %c0_64, %c0_65] : memref<12x128x128xbf16, #tpu.memory_space<vmem>>, vector<1x128x128xbf16>
    %102 = vector.shape_cast %101 : vector<1x128x128xbf16> to vector<128x128xbf16>
    %cst_66 = arith.constant dense<0.000000e+00> : vector<16x128xf32>
    %103 = tpu.matmul %100, %102, %cst_66 {dimension_numbers = #tpu.dot_dimension_numbers<[1], [0], [0], [1], [0, 0, 1, 1], [], []>} : vector<16x128xbf16>, vector<128x128xbf16>, vector<16x128xf32> -> vector<16x128xf32>
    %104 = arith.addf %96, %103 : vector<16x128xf32>
    %c128 = arith.constant 128 : index
    %c0_67 = arith.constant 0 : index
    %105 = vector.load %arg2[%c128, %c0_67] : memref<396x128xf32, #tpu.memory_space<vmem>>, vector<128x128xf32>
    %cst_68 = arith.constant dense<0.000000e+00> : vector<128xf32>
    %106 = vector.multi_reduction <add>, %104, %cst_68 [0] : vector<16x128xf32> to vector<128xf32>
    %107 = vector.shape_cast %106 : vector<128xf32> to vector<1x128xf32>
    %108 = arith.mulf %104, %104 : vector<16x128xf32>
    %cst_69 = arith.constant dense<0.000000e+00> : vector<128xf32>
    %109 = vector.multi_reduction <add>, %108, %cst_69 [0] : vector<16x128xf32> to vector<128xf32>
    %110 = vector.shape_cast %109 : vector<128xf32> to vector<1x128xf32>
    %111 = tpu.concatenate %107, %110 in 0 : vector<1x128xf32>, vector<1x128xf32> -> vector<2x128xf32>
    %cst_70 = arith.constant dense<0.000000e+00> : vector<2x128xf32>
    %112 = tpu.matmul %111, %105, %cst_70 {dimension_numbers = #tpu.dot_dimension_numbers<[1], [0], [0], [1], [0, 0, 1, 1], [], []>} : vector<2x128xf32>, vector<128x128xf32>, vector<2x128xf32> -> vector<2x128xf32>
    %113 = vector.extract_strided_slice %112 {offsets = [0, 0], sizes = [1, 128], strides = [1, 1]} : vector<2x128xf32> to vector<1x128xf32>
    %114 = vector.extract_strided_slice %112 {offsets = [1, 0], sizes = [1, 128], strides = [1, 1]} : vector<2x128xf32> to vector<1x128xf32>
    %115 = arith.mulf %113, %113 : vector<1x128xf32>
    %116 = arith.subf %114, %115 : vector<1x128xf32>
    %cst_71 = arith.constant 0.000000e+00 : f32
    %117 = vector.broadcast %cst_71 : f32 to vector<1x128xf32>
    %118 = arith.maximumf %116, %117 : vector<1x128xf32>
    %c386 = arith.constant 386 : index
    %c0_72 = arith.constant 0 : index
    %119 = vector.load %arg2[%c386, %c0_72] : memref<396x128xf32, #tpu.memory_space<vmem>>, vector<1x128xf32>
    %c387 = arith.constant 387 : index
    %c0_73 = arith.constant 0 : index
    %120 = vector.load %arg2[%c387, %c0_73] : memref<396x128xf32, #tpu.memory_space<vmem>>, vector<1x128xf32>
    %cst_74 = arith.constant 9.99999974E-6 : f32
    %121 = vector.broadcast %cst_74 : f32 to vector<1x128xf32>
    %122 = arith.addf %118, %121 : vector<1x128xf32>
    %123 = math.rsqrt %122 : vector<1x128xf32>
    %124 = arith.mulf %119, %123 : vector<1x128xf32>
    %125 = arith.mulf %113, %124 : vector<1x128xf32>
    %126 = arith.subf %120, %125 : vector<1x128xf32>
    %127 = vector.broadcast %124 : vector<1x128xf32> to vector<16x128xf32>
    %128 = arith.mulf %104, %127 : vector<16x128xf32>
    %129 = vector.broadcast %126 : vector<1x128xf32> to vector<16x128xf32>
    %130 = arith.addf %128, %129 : vector<16x128xf32>
    %cst_75 = arith.constant 0.000000e+00 : f32
    %131 = vector.broadcast %cst_75 : f32 to vector<16x128xf32>
    %132 = arith.cmpf oge, %130, %131 : vector<16x128xf32>
    %cst_76 = arith.constant 2.000000e-01 : f32
    %133 = vector.broadcast %cst_76 : f32 to vector<16x128xf32>
    %134 = arith.mulf %133, %130 : vector<16x128xf32>
    %135 = arith.select %132, %130, %134 : vector<16x128xi1>, vector<16x128xf32>
    %136 = vector.extract_strided_slice %135 {offsets = [0, 0], sizes = [8, 128], strides = [1, 1]} : vector<16x128xf32> to vector<8x128xf32>
    %c8_77 = arith.constant 8 : index
    %c0_78 = arith.constant 0 : index
    %137 = vector.load %arg5[%c8_77, %c0_78] : memref<48x128xf32, #tpu.memory_space<vmem>>, vector<8x128xf32>
    tpu.vector_store %arg5[%c8_77, %c0_78], %136 {strides = array<i32>} : memref<48x128xf32, #tpu.memory_space<vmem>>, vector<8x128xf32>,
    %138 = vector.extract_strided_slice %135 {offsets = [8, 0], sizes = [8, 128], strides = [1, 1]} : vector<16x128xf32> to vector<8x128xf32>
    %c32 = arith.constant 32 : index
    %c0_79 = arith.constant 0 : index
    %139 = vector.load %arg5[%c32, %c0_79] : memref<48x128xf32, #tpu.memory_space<vmem>>, vector<8x128xf32>
    tpu.vector_store %arg5[%c32, %c0_79], %138 {strides = array<i32>} : memref<48x128xf32, #tpu.memory_space<vmem>>, vector<8x128xf32>,
    %cst_80 = arith.constant 0.000000e+00 : f32
    %140 = vector.broadcast %cst_80 : f32 to vector<8x128xf32>
    %c7_81 = arith.constant 7 : index
    %c0_82 = arith.constant 0 : index
    %141 = tpu.strided_load %arg5[%c7_81, %c0_82] {strides = array<i32: 2, 1>} : memref<48x128xf32, #tpu.memory_space<vmem>>, vector<4x128xf32>
    %c31 = arith.constant 31 : index
    %c0_83 = arith.constant 0 : index
    %142 = tpu.strided_load %arg5[%c31, %c0_83] {strides = array<i32: 2, 1>} : memref<48x128xf32, #tpu.memory_space<vmem>>, vector<4x128xf32>
    %143 = tpu.concatenate %141, %142 in 0 : vector<4x128xf32>, vector<4x128xf32> -> vector<8x128xf32>
    %144 = arith.truncf %143 : vector<8x128xf32> to vector<8x128xbf16>
    %c8_84 = arith.constant 8 : index
    %c0_85 = arith.constant 0 : index
    %c0_86 = arith.constant 0 : index
    %145 = vector.load %arg1[%c8_84, %c0_85, %c0_86] : memref<12x128x128xbf16, #tpu.memory_space<vmem>>, vector<1x128x128xbf16>
    %146 = vector.shape_cast %145 : vector<1x128x128xbf16> to vector<128x128xbf16>
    %cst_87 = arith.constant dense<0.000000e+00> : vector<8x128xf32>
    %147 = tpu.matmul %144, %146, %cst_87 {dimension_numbers = #tpu.dot_dimension_numbers<[1], [0], [0], [1], [0, 0, 1, 1], [], []>} : vector<8x128xbf16>, vector<128x128xbf16>, vector<8x128xf32> -> vector<8x128xf32>
    %148 = arith.addf %140, %147 : vector<8x128xf32>
    %c8_88 = arith.constant 8 : index
    %c0_89 = arith.constant 0 : index
    %149 = tpu.strided_load %arg5[%c8_88, %c0_89] {strides = array<i32: 2, 1>} : memref<48x128xf32, #tpu.memory_space<vmem>>, vector<4x128xf32>
    %c32_90 = arith.constant 32 : index
    %c0_91 = arith.constant 0 : index
    %150 = tpu.strided_load %arg5[%c32_90, %c0_91] {strides = array<i32: 2, 1>} : memref<48x128xf32, #tpu.memory_space<vmem>>, vector<4x128xf32>
    %151 = tpu.concatenate %149, %150 in 0 : vector<4x128xf32>, vector<4x128xf32> -> vector<8x128xf32>
    %152 = arith.truncf %151 : vector<8x128xf32> to vector<8x128xbf16>
    %c9_92 = arith.constant 9 : index
    %c0_93 = arith.constant 0 : index
    %c0_94 = arith.constant 0 : index
    %153 = vector.load %arg1[%c9_92, %c0_93, %c0_94] : memref<12x128x128xbf16, #tpu.memory_space<vmem>>, vector<1x128x128xbf16>
    %154 = vector.shape_cast %153 : vector<1x128x128xbf16> to vector<128x128xbf16>
    %cst_95 = arith.constant dense<0.000000e+00> : vector<8x128xf32>
    %155 = tpu.matmul %152, %154, %cst_95 {dimension_numbers = #tpu.dot_dimension_numbers<[1], [0], [0], [1], [0, 0, 1, 1], [], []>} : vector<8x128xbf16>, vector<128x128xbf16>, vector<8x128xf32> -> vector<8x128xf32>
    %156 = arith.addf %148, %155 : vector<8x128xf32>
    %c9_96 = arith.constant 9 : index
    %c0_97 = arith.constant 0 : index
    %157 = tpu.strided_load %arg5[%c9_96, %c0_97] {strides = array<i32: 2, 1>} : memref<48x128xf32, #tpu.memory_space<vmem>>, vector<4x128xf32>
    %c33 = arith.constant 33 : index
    %c0_98 = arith.constant 0 : index
    %158 = tpu.strided_load %arg5[%c33, %c0_98] {strides = array<i32: 2, 1>} : memref<48x128xf32, #tpu.memory_space<vmem>>, vector<4x128xf32>
    %159 = tpu.concatenate %157, %158 in 0 : vector<4x128xf32>, vector<4x128xf32> -> vector<8x128xf32>
    %160 = arith.truncf %159 : vector<8x128xf32> to vector<8x128xbf16>
    %c10_99 = arith.constant 10 : index
    %c0_100 = arith.constant 0 : index
    %c0_101 = arith.constant 0 : index
    %161 = vector.load %arg1[%c10_99, %c0_100, %c0_101] : memref<12x128x128xbf16, #tpu.memory_space<vmem>>, vector<1x128x128xbf16>
    %162 = vector.shape_cast %161 : vector<1x128x128xbf16> to vector<128x128xbf16>
    %cst_102 = arith.constant dense<0.000000e+00> : vector<8x128xf32>
    %163 = tpu.matmul %160, %162, %cst_102 {dimension_numbers = #tpu.dot_dimension_numbers<[1], [0], [0], [1], [0, 0, 1, 1], [], []>} : vector<8x128xbf16>, vector<128x128xbf16>, vector<8x128xf32> -> vector<8x128xf32>
    %164 = arith.addf %156, %163 : vector<8x128xf32>
    %c10_103 = arith.constant 10 : index
    %c0_104 = arith.constant 0 : index
    %165 = tpu.strided_load %arg5[%c10_103, %c0_104] {strides = array<i32: 2, 1>} : memref<48x128xf32, #tpu.memory_space<vmem>>, vector<4x128xf32>
    %c34 = arith.constant 34 : index
    %c0_105 = arith.constant 0 : index
    %166 = tpu.strided_load %arg5[%c34, %c0_105] {strides = array<i32: 2, 1>} : memref<48x128xf32, #tpu.memory_space<vmem>>, vector<4x128xf32>
    %167 = tpu.concatenate %165, %166 in 0 : vector<4x128xf32>, vector<4x128xf32> -> vector<8x128xf32>
    %168 = arith.truncf %167 : vector<8x128xf32> to vector<8x128xbf16>
    %c11 = arith.constant 11 : index
    %c0_106 = arith.constant 0 : index
    %c0_107 = arith.constant 0 : index
    %169 = vector.load %arg1[%c11, %c0_106, %c0_107] : memref<12x128x128xbf16, #tpu.memory_space<vmem>>, vector<1x128x128xbf16>
    %170 = vector.shape_cast %169 : vector<1x128x128xbf16> to vector<128x128xbf16>
    %cst_108 = arith.constant dense<0.000000e+00> : vector<8x128xf32>
    %171 = tpu.matmul %168, %170, %cst_108 {dimension_numbers = #tpu.dot_dimension_numbers<[1], [0], [0], [1], [0, 0, 1, 1], [], []>} : vector<8x128xbf16>, vector<128x128xbf16>, vector<8x128xf32> -> vector<8x128xf32>
    %172 = arith.addf %164, %171 : vector<8x128xf32>
    %c256 = arith.constant 256 : index
    %c0_109 = arith.constant 0 : index
    %173 = vector.load %arg2[%c256, %c0_109] : memref<396x128xf32, #tpu.memory_space<vmem>>, vector<128x128xf32>
    %cst_110 = arith.constant dense<0.000000e+00> : vector<128xf32>
    %174 = vector.multi_reduction <add>, %172, %cst_110 [0] : vector<8x128xf32> to vector<128xf32>
    %175 = vector.shape_cast %174 : vector<128xf32> to vector<1x128xf32>
    %176 = arith.mulf %172, %172 : vector<8x128xf32>
    %cst_111 = arith.constant dense<0.000000e+00> : vector<128xf32>
    %177 = vector.multi_reduction <add>, %176, %cst_111 [0] : vector<8x128xf32> to vector<128xf32>
    %178 = vector.shape_cast %177 : vector<128xf32> to vector<1x128xf32>
    %179 = tpu.concatenate %175, %178 in 0 : vector<1x128xf32>, vector<1x128xf32> -> vector<2x128xf32>
    %cst_112 = arith.constant dense<0.000000e+00> : vector<2x128xf32>
    %180 = tpu.matmul %179, %173, %cst_112 {dimension_numbers = #tpu.dot_dimension_numbers<[1], [0], [0], [1], [0, 0, 1, 1], [], []>} : vector<2x128xf32>, vector<128x128xf32>, vector<2x128xf32> -> vector<2x128xf32>
    %181 = vector.extract_strided_slice %180 {offsets = [0, 0], sizes = [1, 128], strides = [1, 1]} : vector<2x128xf32> to vector<1x128xf32>
    %182 = vector.extract_strided_slice %180 {offsets = [1, 0], sizes = [1, 128], strides = [1, 1]} : vector<2x128xf32> to vector<1x128xf32>
    %183 = arith.mulf %181, %181 : vector<1x128xf32>
    %184 = arith.subf %182, %183 : vector<1x128xf32>
    %cst_113 = arith.constant 0.000000e+00 : f32
    %185 = vector.broadcast %cst_113 : f32 to vector<1x128xf32>
    %186 = arith.maximumf %184, %185 : vector<1x128xf32>
    %c388 = arith.constant 388 : index
    %c0_114 = arith.constant 0 : index
    %187 = vector.load %arg2[%c388, %c0_114] : memref<396x128xf32, #tpu.memory_space<vmem>>, vector<1x128xf32>
    %c389 = arith.constant 389 : index
    %c0_115 = arith.constant 0 : index
    %188 = vector.load %arg2[%c389, %c0_115] : memref<396x128xf32, #tpu.memory_space<vmem>>, vector<1x128xf32>
    %cst_116 = arith.constant 9.99999974E-6 : f32
    %189 = vector.broadcast %cst_116 : f32 to vector<1x128xf32>
    %190 = arith.addf %186, %189 : vector<1x128xf32>
    %191 = math.rsqrt %190 : vector<1x128xf32>
    %192 = arith.mulf %187, %191 : vector<1x128xf32>
    %193 = arith.mulf %181, %192 : vector<1x128xf32>
    %194 = arith.subf %188, %193 : vector<1x128xf32>
    %195 = vector.broadcast %192 : vector<1x128xf32> to vector<8x128xf32>
    %196 = arith.mulf %172, %195 : vector<8x128xf32>
    %197 = vector.broadcast %194 : vector<1x128xf32> to vector<8x128xf32>
    %198 = arith.addf %196, %197 : vector<8x128xf32>
    %cst_117 = arith.constant 0.000000e+00 : f32
    %199 = vector.broadcast %cst_117 : f32 to vector<8x128xf32>
    %200 = arith.cmpf oge, %198, %199 : vector<8x128xf32>
    %cst_118 = arith.constant 2.000000e-01 : f32
    %201 = vector.broadcast %cst_118 : f32 to vector<8x128xf32>
    %202 = arith.mulf %201, %198 : vector<8x128xf32>
    %203 = arith.select %200, %198, %202 : vector<8x128xi1>, vector<8x128xf32>
    %c392 = arith.constant 392 : index
    %c0_119 = arith.constant 0 : index
    %204 = vector.load %arg2[%c392, %c0_119] : memref<396x128xf32, #tpu.memory_space<vmem>>, vector<4x128xf32>
    %205 = vector.extract_strided_slice %203 {offsets = [0, 0], sizes = [4, 128], strides = [1, 1]} : vector<8x128xf32> to vector<4x128xf32>
    %206 = arith.mulf %205, %204 : vector<4x128xf32>
    %207 = vector.shape_cast %206 : vector<4x128xf32> to vector<1x4x128xf32>
    %cst_120 = arith.constant dense<0.000000e+00> : vector<1xf32>
    %208 = vector.multi_reduction <add>, %207, %cst_120 [1, 2] : vector<1x4x128xf32> to vector<1xf32>
    %209 = vector.shape_cast %208 : vector<1xf32> to vector<1x1x1xf32>
    %210 = vector.extract %209[0, 0, 0] : f32 from vector<1x1x1xf32>
    %211 = vector.broadcast %210 : f32 to vector<1x1xf32>
    %212 = vector.extract_strided_slice %203 {offsets = [4, 0], sizes = [4, 128], strides = [1, 1]} : vector<8x128xf32> to vector<4x128xf32>
    %213 = arith.mulf %212, %204 : vector<4x128xf32>
    %214 = vector.shape_cast %213 : vector<4x128xf32> to vector<1x4x128xf32>
    %cst_121 = arith.constant dense<0.000000e+00> : vector<1xf32>
    %215 = vector.multi_reduction <add>, %214, %cst_121 [1, 2] : vector<1x4x128xf32> to vector<1xf32>
    %216 = vector.shape_cast %215 : vector<1xf32> to vector<1x1x1xf32>
    %217 = vector.extract %216[0, 0, 0] : f32 from vector<1x1x1xf32>
    %218 = vector.broadcast %217 : f32 to vector<1x1xf32>
    %219 = tpu.concatenate %211, %218 in 0 : vector<1x1xf32>, vector<1x1xf32> -> vector<2x1xf32>
    %220 = arith.negf %219 : vector<2x1xf32>
    %221 = math.exp %220 : vector<2x1xf32>
    %cst_122 = arith.constant 1.000000e+00 : f32
    %222 = vector.broadcast %cst_122 : f32 to vector<2x1xf32>
    %223 = arith.addf %222, %221 : vector<2x1xf32>
    %224 = arith.divf %222, %223 : vector<2x1xf32>
    %c0_123 = arith.constant 0 : index
    %c0_124 = arith.constant 0 : index
    %225 = vector.load %arg3[%c0_123, %c0_124] : memref<2x1xf32, #tpu.memory_space<vmem>>, vector<2x1xf32>
    tpu.vector_store %arg3[%c0_123, %c0_124], %224 {strides = array<i32>} : memref<2x1xf32, #tpu.memory_space<vmem>>, vector<2x1xf32>,
    return
  }
}

</mosaic_0001>

<bundles_post_ra>
// kernel: tile.33
= control target key start
LH: loop header
LB: loop body
LE: loop exit
PB: predicated region body
PF: predicated region fallthrough
CT: control target
= control target key end

     0   :  { %s28_s0 = inlined_call_operand.vmem [shape: f32[8], index: 0, kind: input, shape index: {}]   ;;  %s29_s1 = inlined_call_operand.vmem [shape: f32[16,8], index: 1, kind: output, shape index: {}]  }
   0x1   :  { %v4_v0 = vld [vmem:[%s28_s0] ss:$0 sm:$0xff] }
   0x2   :  { %5 = vst [vmem:[%s29_s1] sm:$0xff] %v4_v0  ;;  %8 = vst [vmem:[%s29_s1 + $0x8] sm:$0xff] %v4_v0 }

// kernel: tile.34
= control target key start
LH: loop header
LB: loop body
LE: loop exit
PB: predicated region body
PF: predicated region fallthrough
CT: control target
= control target key end

     0   :  { %s131_s10 = smov 120   ;;  %s132_s11 = smov 104   ;;  %vm3_vm0 = vcmask 64512   ;;  %vm9_vm1 = vcmask 1048512   ;;  %vm15_vm2 = vcmask 982912   ;;  %vm21_vm3 = vcmask 917312   ;;  %s207_s0 = inlined_call_operand.vmem [shape: f32[16,8], index: 0, kind: input, shape index: {}]   ;;  %s208_s1 = inlined_call_operand.vmem [shape: f32[1,128], index: 1, kind: output, shape index: {}]  }
   0x1   :  { %v101_v0 = vld [vmem:[%s207_s0 + $0xf] sm:$0x1]   ;;  %v103_v1 = vld [vmem:[%s207_s0 + $0xd] sm:$0x1]   ;;  %v102_v2 = vld [vmem:[%s207_s0 + $0xe] sm:$0x1]  }
   0x2   :  { %7 = vrot.lane.b32.xlu0 %v101_v0, %s131_s10  ;;  %19 = vrot.lane.b32.xlu1 %v103_v1, %s132_s11  ;;  %v104_v3 = vld [vmem:[%s207_s0 + $0xc] sm:$0x1]   ;;  %s133_s16 = smov 112   ;;  %s134_s17 = smov 96   ;;  %v105_v4 = vld [vmem:[%s207_s0 + $0xb] sm:$0x1]  }
   0x3   :  { %v106_v5 = vld [vmem:[%s207_s0 + $0xa] sm:$0x1]   ;;  %v2_v6 = vld [vmem:[%s207_s0] sm:$0x1]   ;;  %s135_s24 = smov 88   ;;  %s136_s25 = smov 80  }
   0x4   :  { %4 = vst.msk [vmem:[#allocation0] sm:$0x1] %vm3_vm0, %v2_v6   ;;  %v107_v7 = vld [vmem:[%s207_s0 + $0x9] sm:$0x1]   ;;  %v108_v8 = vld [vmem:[%s207_s0 + $0x8] sm:$0x1]  }
   0x5   :  { %s137_s30 = smov 72   ;;  %s138_s2 = smov 64   ;;  %v109_v9 = vld [vmem:[%s207_s0 + $0x7] sm:$0x1]   ;;  %v110_v10 = vld [vmem:[%s207_s0 + $0x6] sm:$0x1]  }
   0x6   :  { %13 = vrot.lane.b32.xlu0 %v102_v2, %s133_s16  ;;  %25 = vrot.lane.b32.xlu1 %v104_v3, %s134_s17  ;;  %s139_s7 = smov 56   ;;  %s140_s8 = smov 48   ;;  %v111_v11 = vld [vmem:[%s207_s0 + $0x5] sm:$0x1]   ;;  %v112_v12 = vld [vmem:[%s207_s0 + $0x4] sm:$0x1]  }
   0x7   :  { %s141_s13 = smov 40   ;;  %s142_s14 = smov 32   ;;  %v113_v13 = vld [vmem:[%s207_s0 + $0x3] sm:$0x1]   ;;  %v114_v14 = vld [vmem:[%s207_s0 + $0x2] sm:$0x1]  }
   0x8   :  { %s143_s19 = smov 24   ;;  %s144_s20 = smov 16   ;;  %v115_v15 = vld [vmem:[%s207_s0 + $0x1] sm:$0x1]   ;;  %vm27_vm4 = vcmask 851712   ;;  %vm33_vm5 = vcmask 786112  }
   0x9   :  { %s145_s0 = smov 8   ;;  %vm39_vm6 = vcmask 720512   ;;  %vm45_vm7 = vcmask 654912   ;;  %vm51_vm8 = vcmask 589312   ;;  %vm57_vm9 = vcmask 523712  }
   0xa   :  { %31 = vrot.lane.b32.xlu0 %v105_v4, %s135_s24  ;;  %37 = vrot.lane.b32.xlu1 %v106_v5, %s136_s25  ;;  %vm63_vm10 = vcmask 458112   ;;  %vm69_vm11 = vcmask 392512   ;;  %vm75_vm12 = vcmask 326912   ;;  %vm81_vm13 = vcmask 261312  }
   0xb   :  { %vm87_vm14 = vcmask 195712   ;;  %vm93_vm15 = vcmask 130112  }
   0xe   :  { %43 = vrot.lane.b32.xlu0 %v107_v7, %s137_s30  ;;  %49 = vrot.lane.b32.xlu1 %v108_v8, %s138_s2 }
  0x12   :  { %55 = vrot.lane.b32.xlu0 %v109_v9, %s139_s7  ;;  %61 = vrot.lane.b32.xlu1 %v110_v10, %s140_s8 }
  0x16   :  { %67 = vrot.lane.b32.xlu0 %v111_v11, %s141_s13  ;;  %73 = vrot.lane.b32.xlu1 %v112_v12, %s142_s14 }
  0x1a   :  { %79 = vrot.lane.b32.xlu0 %v113_v13, %s143_s19  ;;  %85 = vrot.lane.b32.xlu1 %v114_v14, %s144_s20 }
  0x1e   :  { %91 = vrot.lane.b32.xlu0 %v115_v15, %s145_s0 }
  0x74   :  { %v8_v16 = vpop.permute.xlu0 %7   ;;  %v20_v17 = vpop.permute.xlu1 %19  }
  0x75   :  { %10 = vst.msk [vmem:[#allocation0] sm:$0x1] %vm9_vm1, %v8_v16  }
  0x78   :  { %v14_v18 = vpop.permute.xlu0 %13   ;;  %v26_v19 = vpop.permute.xlu1 %25  }
  0x79   :  { %16 = vst.msk [vmem:[#allocation0] sm:$0x1] %vm15_vm2, %v14_v18  }
  0x7a   :  { %22 = vst.msk [vmem:[#allocation0] sm:$0x1] %vm21_vm3, %v20_v17  }
  0x7b   :  { %28 = vst.msk [vmem:[#allocation0] sm:$0x1] %vm27_vm4, %v26_v19  }
  0x7c   :  { %v32_v20 = vpop.permute.xlu0 %31   ;;  %v38_v21 = vpop.permute.xlu1 %37  }
  0x7d   :  { %34 = vst.msk [vmem:[#allocation0] sm:$0x1] %vm33_vm5, %v32_v20  }
  0x7e   :  { %40 = vst.msk [vmem:[#allocation0] sm:$0x1] %vm39_vm6, %v38_v21  }
  0x80   :  { %v44_v22 = vpop.permute.xlu0 %43   ;;  %v50_v23 = vpop.permute.xlu1 %49  }
  0x81   :  { %46 = vst.msk [vmem:[#allocation0] sm:$0x1] %vm45_vm7, %v44_v22  }
  0x82   :  { %52 = vst.msk [vmem:[#allocation0] sm:$0x1] %vm51_vm8, %v50_v23  }
  0x84   :  { %v56_v24 = vpop.permute.xlu0 %55   ;;  %v62_v25 = vpop.permute.xlu1 %61  }
  0x85   :  { %58 = vst.msk [vmem:[#allocation0] sm:$0x1] %vm57_vm9, %v56_v24  }
  0x86   :  { %64 = vst.msk [vmem:[#allocation0] sm:$0x1] %vm63_vm10, %v62_v25  }
  0x88   :  { %v68_v26 = vpop.permute.xlu0 %67   ;;  %v74_v27 = vpop.permute.xlu1 %73  }
  0x89   :  { %70 = vst.msk [vmem:[#allocation0] sm:$0x1] %vm69_vm11, %v68_v26  }
  0x8a   :  { %76 = vst.msk [vmem:[#allocation0] sm:$0x1] %vm75_vm12, %v74_v27  }
  0x8c   :  { %v80_v28 = vpop.permute.xlu0 %79   ;;  %v86_v29 = vpop.permute.xlu1 %85  }
  0x8d   :  { %82 = vst.msk [vmem:[#allocation0] sm:$0x1] %vm81_vm13, %v80_v28  }
  0x8e   :  { %88 = vst.msk [vmem:[#allocation0] sm:$0x1] %vm87_vm14, %v86_v29  }
  0x90   :  { %v92_v30 = vpop.permute.xlu0 %91  }
  0x91   :  { %94 = vst.msk [vmem:[#allocation0] sm:$0x1] %vm93_vm15, %v92_v30  }
  0x98   :  { %v98_v31 = vld [vmem:[#allocation0] sm:$0x1] }
  0x99   :  { %100 = vst [vmem:[%s208_s1] sm:$0x1] %v98_v31 }

// kernel: tile.43
= control target key start
LH: loop header
LB: loop body
LE: loop exit
PB: predicated region body
PF: predicated region fallthrough
CT: control target
= control target key end

     0   :  { %s22_s0 = inlined_call_operand.vmem [shape: f32[16], index: 0, kind: input, shape index: {}]   ;;  %s23_s1 = inlined_call_operand.vmem [shape: f32[8,16], index: 1, kind: output, shape index: {}]  }
   0x1   :  { %v4_v0 = vld [vmem:[%s22_s0] ss:$0 sm:$0xff] }
   0x2   :  { %5 = vst [vmem:[%s23_s1] sm:$0xff] %v4_v0 }

// kernel: tile.44
= control target key start
LH: loop header
LB: loop body
LE: loop exit
PB: predicated region body
PF: predicated region fallthrough
CT: control target
= control target key end

     0   :  { %s67_s10 = smov 112   ;;  %s68_s11 = smov 80   ;;  %vm3_vm0 = vcmask 130048   ;;  %vm9_vm1 = vcmask 1048448   ;;  %vm15_vm2 = vcmask 917248   ;;  %vm21_vm3 = vcmask 786048   ;;  %s111_s0 = inlined_call_operand.vmem [shape: f32[8,16], index: 0, kind: input, shape index: {}]   ;;  %s112_s1 = inlined_call_operand.vmem [shape: f32[1,128], index: 1, kind: output, shape index: {}]  }
   0x1   :  { %v53_v0 = vld [vmem:[%s111_s0 + $0x7] sm:$0x1]   ;;  %v55_v1 = vld [vmem:[%s111_s0 + $0x5] sm:$0x1]   ;;  %v54_v2 = vld [vmem:[%s111_s0 + $0x6] sm:$0x1]  }
   0x2   :  { %7 = vrot.lane.b32.xlu0 %v53_v0, %s67_s10  ;;  %19 = vrot.lane.b32.xlu1 %v55_v1, %s68_s11  ;;  %v56_v3 = vld [vmem:[%s111_s0 + $0x4] sm:$0x1]   ;;  %v2_v4 = vld [vmem:[%s111_s0] sm:$0x1]   ;;  %s69_s18 = smov 96   ;;  %s70_s19 = smov 64  }
   0x3   :  { %4 = vst.msk [vmem:[#allocation0] sm:$0x1] %vm3_vm0, %v2_v4   ;;  %v57_v5 = vld [vmem:[%s111_s0 + $0x3] sm:$0x1]   ;;  %v58_v6 = vld [vmem:[%s111_s0 + $0x2] sm:$0x1]  }
   0x4   :  { %s71_s24 = smov 48   ;;  %s72_s25 = smov 32   ;;  %v59_v7 = vld [vmem:[%s111_s0 + $0x1] sm:$0x1]   ;;  %vm27_vm4 = vcmask 654848   ;;  %vm33_vm5 = vcmask 523648  }
   0x5   :  { %s73_s0 = smov 16   ;;  %vm39_vm6 = vcmask 392448   ;;  %vm45_vm7 = vcmask 261248  }
   0x6   :  { %13 = vrot.lane.b32.xlu0 %v54_v2, %s69_s18  ;;  %25 = vrot.lane.b32.xlu1 %v56_v3, %s70_s19 }
   0xa   :  { %31 = vrot.lane.b32.xlu0 %v57_v5, %s71_s24  ;;  %37 = vrot.lane.b32.xlu1 %v58_v6, %s72_s25 }
   0xe   :  { %43 = vrot.lane.b32.xlu0 %v59_v7, %s73_s0 }
  0x74   :  { %v8_v8 = vpop.permute.xlu0 %7   ;;  %v20_v9 = vpop.permute.xlu1 %19  }
  0x75   :  { %10 = vst.msk [vmem:[#allocation0] sm:$0x1] %vm9_vm1, %v8_v8  }
  0x78   :  { %v14_v10 = vpop.permute.xlu0 %13   ;;  %v26_v11 = vpop.permute.xlu1 %25  }
  0x79   :  { %16 = vst.msk [vmem:[#allocation0] sm:$0x1] %vm15_vm2, %v14_v10  }
  0x7a   :  { %22 = vst.msk [vmem:[#allocation0] sm:$0x1] %vm21_vm3, %v20_v9  }
  0x7b   :  { %28 = vst.msk [vmem:[#allocation0] sm:$0x1] %vm27_vm4, %v26_v11  }
  0x7c   :  { %v32_v12 = vpop.permute.xlu0 %31   ;;  %v38_v13 = vpop.permute.xlu1 %37  }
  0x7d   :  { %34 = vst.msk [vmem:[#allocation0] sm:$0x1] %vm33_vm5, %v32_v12  }
  0x7e   :  { %40 = vst.msk [vmem:[#allocation0] sm:$0x1] %vm39_vm6, %v38_v13  }
  0x80   :  { %v44_v14 = vpop.permute.xlu0 %43  }
  0x81   :  { %46 = vst.msk [vmem:[#allocation0] sm:$0x1] %vm45_vm7, %v44_v14  }
  0x88   :  { %v50_v15 = vld [vmem:[#allocation0] sm:$0x1] }
  0x89   :  { %52 = vst [vmem:[%s112_s1] sm:$0x1] %v50_v15 }

// kernel: tile.53
= control target key start
LH: loop header
LB: loop body
LE: loop exit
PB: predicated region body
PF: predicated region fallthrough
CT: control target
= control target key end

     0   :  { %s22_s0 = inlined_call_operand.vmem [shape: f32[32], index: 0, kind: input, shape index: {}]   ;;  %s23_s1 = inlined_call_operand.vmem [shape: f32[4,32], index: 1, kind: output, shape index: {}]  }
   0x1   :  { %v4_v0 = vld [vmem:[%s22_s0] ss:$0 sm:$0xff] }
   0x2   :  { %5 = vst [vmem:[%s23_s1] sm:$0xf] %v4_v0 }

// kernel: tile.54
= control target key start
LH: loop header
LB: loop body
LE: loop exit
PB: predicated region body
PF: predicated region fallthrough
CT: control target
= control target key end

     0   :  { %vm7_vm0 = vcmask 261120   ;;  %s37_s8 = smov 32   ;;  %s38_s9 = smov 64   ;;  %vm13_vm1 = vcmask 1048320   ;;  %vm19_vm2 = vcmask 785920   ;;  %vm25_vm3 = vcmask 523520   ;;  %s55_s0 = inlined_call_operand.vmem [shape: f32[4,32], index: 0, kind: input, shape index: {}]   ;;  %s56_s1 = inlined_call_operand.vmem [shape: f32[1,128], index: 1, kind: output, shape index: {}]  }
   0x1   :  { %v4_v0 = vld [vmem:[%s55_s0] sm:$0xf]  ;;  %s36_s0 = smov 96  }
   0x2   :  { %5 = vst [vmem:[#allocation1] sm:$0xf] %v4_v0 }
   0x9   :  { %v10_v1 = vld [vmem:[#allocation1 + $0x3] sm:$0x1]   ;;  %v22_v2 = vld [vmem:[#allocation1 + $0x1] sm:$0x1]   ;;  %v6_v3 = vld [vmem:[#allocation1] sm:$0x1]  }
   0xa   :  { %11 = vrot.lane.b32.xlu0 %v10_v1, %s36_s0  ;;  %23 = vrot.lane.b32.xlu1 %v22_v2, %s37_s8  ;;  %v16_v4 = vld [vmem:[#allocation1 + $0x2] sm:$0x1]   ;;  %8 = vst.msk [vmem:[#allocation0] sm:$0x1] %vm7_vm0, %v6_v3  }
   0xe   :  { %17 = vrot.lane.b32.xlu0 %v16_v4, %s38_s9 }
  0x7c   :  { %v12_v5 = vpop.permute.xlu0 %11   ;;  %v24_v6 = vpop.permute.xlu1 %23  }
  0x7d   :  { %14 = vst.msk [vmem:[#allocation0] sm:$0x1] %vm13_vm1, %v12_v5  }
  0x80   :  { %v18_v7 = vpop.permute.xlu0 %17  }
  0x81   :  { %20 = vst.msk [vmem:[#allocation0] sm:$0x1] %vm19_vm2, %v18_v7  }
  0x82   :  { %26 = vst.msk [vmem:[#allocation0] sm:$0x1] %vm25_vm3, %v24_v6  }
  0x89   :  { %v30_v8 = vld [vmem:[#allocation0] sm:$0x1] }
  0x8a   :  { %32 = vst [vmem:[%s56_s1] sm:$0x1] %v30_v8 }

// kernel: discriminator_forward.1
= control target key start
LH: loop header
LB: loop body
LE: loop exit
PB: predicated region body
PF: predicated region fallthrough
CT: control target
= control target key end

     0   :  { %v2927_v59 = vmov 0.0|0.0   ;;  %vm2928_vm0 = vmmov 0   ;;  %vm570_vm1 = vcmask 1040384   ;;  %vm1284_vm8 = vcmask 1043456   ;;  %s3626_s1 = inlined_call_operand.vmem [shape: bf16[12,128,128], index: 1, kind: input, shape index: {}]   ;;  %s3627_s0 = inlined_call_operand.vmem [shape: f32[96,128], index: 0, kind: input, shape index: {}]   ;;  %s3628_s2 = inlined_call_operand.vmem [shape: f32[396,128], index: 2, kind: input, shape index: {}]   ;;  %s3629_s3 = inlined_call_operand.vmem [shape: f32[2,1], index: 3, kind: output, shape index: {}]  }
   0x1   :  { %v2821_v0 = vld [vmem:[%s3626_s1 + $0x40] sm:$0xff]   ;;  %v2823_v2 = vld [vmem:[%s3626_s1 + $0x48] sm:$0xff]   ;;  %v2825_v4 = vld [vmem:[%s3626_s1 + $0x50] sm:$0xff]   ;;  %vm1903_vm10 = vcmask 1024  }
   0x2   :  { %v2822_v1 = vld [vmem:[%s3626_s1 + $0x80] sm:$0xff]   ;;  %2361 = vmatprep.subr.bf16.mxu1 %v2821_v0  ;;  %v2824_v3 = vld [vmem:[%s3626_s1 + $0x88] sm:$0xff]   ;;  %v2826_v5 = vld [vmem:[%s3626_s1 + $0x90] sm:$0xff]  }
   0x3   :  { %2401 = vmatprep.subr.bf16.mxu0 %v2822_v1  ;;  %2362 = vmatpush3.bf16.msra.mxu1 %v2821_v0  ;;  %v2827_v6 = vld [vmem:[%s3626_s1 + $0x58] sm:$0xff]   ;;  %v2829_v8 = vld [vmem:[%s3626_s1 + $0x60] sm:$0xff]   ;;  %v2831_v10 = vld [vmem:[%s3626_s1 + $0x68] sm:$0xff]  }
   0x4   :  { %2402 = vmatpush3.bf16.msra.mxu0 %v2822_v1  ;;  %2363 = vmatprep.subr.bf16.mxu1 %v2823_v2  ;;  %v2828_v7 = vld [vmem:[%s3626_s1 + $0x98] sm:$0xff]   ;;  %v2830_v9 = vld [vmem:[%s3626_s1 + $0xa0] sm:$0xff]   ;;  %v1913_v11 = vld [vmem:[%s3627_s0 + $0x8] ss:$2 sm:$0xff] }
   0x5   :  { %2403 = vmatprep.subr.bf16.mxu0 %v2824_v3  ;;  %v1914_v12 = vld [vmem:[%s3627_s0 + $0x18] ss:$2 sm:$0xff]  ;;  %v2832_v13 = vld [vmem:[%s3626_s1 + $0xa8] sm:$0xff]   ;;  %v1950_v16 = vld [vmem:[%s3627_s0 + $0x19] ss:$2 sm:$0xff] }
   0x6   :  { %v63_v14 = vpack.c.bf16 %v1914_v12, %v1913_v11  ;;  %v1949_v15 = vld [vmem:[%s3627_s0 + $0x9] ss:$2 sm:$0xff]  ;;  %v2835_v20 = vld [vmem:[%s3626_s1 + $0x78] sm:$0xff]   ;;  %v2837_v23 = vld [vmem:[%s3626_s1] sm:$0xff]  }
   0x7   :  { %2364 = vmatpush3.bf16.msra.mxu1 %v2823_v2  ;;  %v284_v17 = vpack.c.bf16 %v1950_v16, %v1949_v15  ;;  %v2833_v18 = vld [vmem:[%s3626_s1 + $0x70] sm:$0xff]   ;;  %v2836_v21 = vld [vmem:[%s3626_s1 + $0xb8] sm:$0xff]   ;;  %v2838_v27 = vld [vmem:[%s3626_s1 + $0xc0] sm:$0xff]  }
   0x8   :  { %2404 = vmatpush3.bf16.msra.mxu0 %v2824_v3  ;;  %2365 = vmatprep.subr.bf16.mxu1 %v2825_v4  ;;  %v2834_v19 = vld [vmem:[%s3626_s1 + $0xb0] sm:$0xff]   ;;  %v1915_v22 = vld [vmem:[%s3627_s0 + $0x38] ss:$2 sm:$0xff]  ;;  %v1951_v25 = vld [vmem:[%s3627_s0 + $0x39] ss:$2 sm:$0xff] }
   0x9   :  { %2405 = vmatprep.subr.bf16.mxu0 %v2826_v5  ;;  %2377 = vmatprep.mubr.bf16.mxu1 %v63_v14  ;;  %v1916_v24 = vld [vmem:[%s3627_s0 + $0x48] ss:$2 sm:$0xff]  ;;  %v1952_v26 = vld [vmem:[%s3627_s0 + $0x49] ss:$2 sm:$0xff]  ;;  %v2843_v40 = vld [vmem:[%s3626_s1 + $0x18] sm:$0xff]  }
   0xa   :  { %2417 = vmatprep.mubr.bf16.mxu0 %v284_v17  ;;  %v64_v28 = vpack.c.bf16 %v1916_v24, %v1915_v22  ;;  %v285_v29 = vpack.c.bf16 %v1952_v26, %v1951_v25  ;;  %v2839_v30 = vld [vmem:[%s3626_s1 + $0x8] sm:$0xff]   ;;  %v1910_v33 = vld [vmem:[%s3627_s0 + $0x17] ss:$2 sm:$0xff] }
   0xb   :  { %2366 = vmatpush3.bf16.msra.mxu1 %v2825_v4  ;;  %v2840_v31 = vld [vmem:[%s3626_s1 + $0xc8] sm:$0xff]   ;;  %v2841_v36 = vld [vmem:[%s3626_s1 + $0x10] sm:$0xff]   ;;  %v2844_v41 = vld [vmem:[%s3626_s1 + $0xd8] sm:$0xff]  }
   0xc   :  { %2406 = vmatpush3.bf16.msra.mxu0 %v2826_v5  ;;  %2367 = vmatprep.subr.bf16.mxu1 %v2827_v6  ;;  %v1909_v32 = vld [vmem:[%s3627_s0 + $0x7] ss:$2 sm:$0xff]  ;;  %v1977_v34 = vld [vmem:[%s3627_s0 + $0xa] ss:$2 sm:$0xff]  ;;  %v1978_v35 = vld [vmem:[%s3627_s0 + $0x1a] ss:$2 sm:$0xff] }
   0xd   :  { %2407 = vmatprep.subr.bf16.mxu0 %v2828_v7  ;;  %v37_v37 = vpack.c.bf16 %v1910_v33, %v1909_v32  ;;  %v412_v38 = vpack.c.bf16 %v1978_v35, %v1977_v34  ;;  %v2842_v39 = vld [vmem:[%s3626_s1 + $0xd0] sm:$0xff]   ;;  %v2845_v42 = vld [vmem:[%s3626_s1 + $0x20] sm:$0xff]   ;;  %v2847_v44 = vld [vmem:[%s3626_s1 + $0x28] sm:$0xff]  }
   0xe   :  { %v2846_v43 = vld [vmem:[%s3626_s1 + $0xe0] sm:$0xff]   ;;  %v2848_v45 = vld [vmem:[%s3626_s1 + $0xe8] sm:$0xff]   ;;  %v2849_v46 = vld [vmem:[%s3626_s1 + $0x30] sm:$0xff]  }
   0xf   :  { %2368 = vmatpush3.bf16.msra.mxu1 %v2827_v6  ;;  %v2850_v47 = vld [vmem:[%s3626_s1 + $0xf0] sm:$0xff]   ;;  %v2851_v48 = vld [vmem:[%s3626_s1 + $0x38] sm:$0xff]   ;;  %v532_v54 = vld [vmem:[%s3628_s2] sm:$0xff] }
  0x10   :  { %2408 = vmatpush3.bf16.msra.mxu0 %v2828_v7  ;;  %2369 = vmatprep.subr.bf16.mxu1 %v2829_v8  ;;  %v2852_v49 = vld [vmem:[%s3626_s1 + $0xf8] sm:$0xff]   ;;  %v1912_v51 = vld [vmem:[%s3627_s0 + $0x47] ss:$2 sm:$0xff] }
  0x11   :  { %2409 = vmatprep.subr.bf16.mxu0 %v2830_v9  ;;  %v1911_v50 = vld [vmem:[%s3627_s0 + $0x37] ss:$2 sm:$0xff]  ;;  %v1979_v52 = vld [vmem:[%s3627_s0 + $0x3a] ss:$2 sm:$0xff]  ;;  %v1980_v53 = vld [vmem:[%s3627_s0 + $0x4a] ss:$2 sm:$0xff] }
  0x12   :  { %v533_v55 = vld [vmem:[%s3628_s2 + $0x8] sm:$0xff]  ;;  %v38_v56 = vpack.c.bf16 %v1912_v51, %v1911_v50  ;;  %v413_v57 = vpack.c.bf16 %v1980_v53, %v1979_v52  ;;  %v534_v60 = vld [vmem:[%s3628_s2 + $0x10] sm:$0xff]  ;;  %v535_v61 = vld [vmem:[%s3628_s2 + $0x18] sm:$0xff] }
  0x13   :  { %2370 = vmatpush3.bf16.msra.mxu1 %v2829_v8  ;;  %v2707_v58 = vpack.c.bf16 %v533_v55, %v532_v54  ;;  %v2710_v62 = vpack.c.bf16 %v535_v61, %v534_v60  ;;  %v536_v63 = vld [vmem:[%s3628_s2 + $0x20] sm:$0xff]  ;;  %v537_v0 = vld [vmem:[%s3628_s2 + $0x28] sm:$0xff]  ;;  %v538_v2 = vld [vmem:[%s3628_s2 + $0x30] sm:$0xff] }
  0x14   :  { %2410 = vmatpush3.bf16.msra.mxu0 %v2830_v9  ;;  %2371 = vmatprep.subr.bf16.mxu1 %v2831_v10  ;;  %v2713_v1 = vpack.c.bf16 %v537_v0, %v536_v63  ;;  %v539_v3 = vld [vmem:[%s3628_s2 + $0x38] sm:$0xff]  ;;  %v540_v5 = vld [vmem:[%s3628_s2 + $0x40] sm:$0xff]  ;;  %v541_v6 = vld [vmem:[%s3628_s2 + $0x48] sm:$0xff] }
  0x15   :  { %2411 = vmatprep.subr.bf16.mxu0 %v2832_v13  ;;  %v2716_v4 = vpack.c.bf16 %v539_v3, %v538_v2  ;;  %v2719_v7 = vpack.c.bf16 %v541_v6, %v540_v5  ;;  %v542_v8 = vld [vmem:[%s3628_s2 + $0x50] sm:$0xff]  ;;  %v543_v9 = vld [vmem:[%s3628_s2 + $0x58] sm:$0xff]  ;;  %v544_v11 = vld [vmem:[%s3628_s2 + $0x60] sm:$0xff]  ;;  %v658_v5 = vlaneseq }
  0x16   :  { %v545_v12 = vld [vmem:[%s3628_s2 + $0x68] sm:$0xff]  ;;  %v546_v15 = vld [vmem:[%s3628_s2 + $0x70] sm:$0xff]  ;;  %v547_v16 = vld [vmem:[%s3628_s2 + $0x78] sm:$0xff] }
  0x17   :  { %2372 = vmatpush3.bf16.msra.mxu1 %v2831_v10  ;;  %v2722_v10 = vpack.c.bf16 %v543_v9, %v542_v8  ;;  %v2725_v14 = vpack.c.bf16 %v545_v12, %v544_v11  ;;  %v2728_v17 = vpack.c.bf16 %v547_v16, %v546_v15  ;;  %v2853_v53 = vld [vmem:[%s3626_s1 + $0x140] sm:$0xff]   ;;  %v2854_v54 = vld [vmem:[%s3626_s1 + $0x148] sm:$0xff]   ;;  %v2855_v55 = vld [vmem:[%s3626_s1 + $0x150] sm:$0xff]   ;;  %v659_v9 = vshrl.u32 %v658_v5, 7 }
  0x18   :  { %2412 = vmatpush3.bf16.msra.mxu0 %v2832_v13  ;;  %2373 = vmatprep.subr.bf16.mxu1 %v2833_v18  ;;  %v2929_v13 = vmov 0.0   ;;  %v2859_v60 = vld [vmem:[%s3626_s1 + $0x170] sm:$0xff]   ;;  %v2860_v61 = vld [vmem:[%s3626_s1 + $0x178] sm:$0xff]   ;;  %v1138_v6 = vld [vmem:[%s3628_s2 + $0x80] sm:$0xff] }
  0x19   :  { %2413 = vmatprep.subr.bf16.mxu0 %v2834_v19  ;;  %15 = vst [vmem:[#allocation2] sm:$0xff] %v2929_v13  ;;  %18 = vst [vmem:[#allocation2 + $0x18] sm:$0xff] %v2929_v13  ;;  %v1140_v8 = vld [vmem:[%s3628_s2 + $0x90] sm:$0xff]  ;;  %v1141_v11 = vld [vmem:[%s3628_s2 + $0x98] sm:$0xff] }
  0x1a   :  { %19 = vst [vmem:[#allocation2 + $0x20] sm:$0xff] %v2929_v13  ;;  %22 = vst [vmem:[#allocation2 + $0x38] sm:$0xff] %v2929_v13  ;;  %v2734_v12 = vpack.c.bf16 %v1141_v11, %v1140_v8  ;;  %v648_v15 = vld [vmem:[%s3628_s2 + $0x180] sm:$0x1]  ;;  %v2880_v8 = vld [vmem:[%s3626_s1 + $0x1d8] sm:$0xff]  }
  0x1b   :  { %2374 = vmatpush3.bf16.msra.mxu1 %v2833_v18  ;;  %23 = vst [vmem:[#allocation3] sm:$0xff] %v2929_v13  ;;  %25 = vst [vmem:[#allocation3 + $0x10] sm:$0xff] %v2929_v13  ;;  %v1142_v16 = vld [vmem:[%s3628_s2 + $0xa0] sm:$0xff]  ;;  %v2883_v11 = vld [vmem:[%s3626_s1 + $0x1f0] sm:$0xff]  }
  0x1c   :  { %2414 = vmatpush3.bf16.msra.mxu0 %v2834_v19  ;;  %2375 = vmatprep.subr.bf16.mxu1 %v2835_v20  ;;  %26 = vst [vmem:[#allocation3 + $0x18] sm:$0xff] %v2929_v13  ;;  %28 = vst [vmem:[#allocation3 + $0x28] sm:$0xff] %v2929_v13 }
  0x1d   :  { %2415 = vmatprep.subr.bf16.mxu0 %v2836_v21 }
  0x1f   :  { %2376 = vmatpush3.bf16.msra.mxu1 %v2835_v20 }
  0x20   :  { %2416 = vmatpush3.bf16.msra.mxu0 %v2836_v21  ;;  %2381 = vmatprep.subr.bf16.mxu1 %v2837_v23 }
  0x21   :  { %2421 = vmatprep.subr.bf16.mxu0 %v2838_v27 }
  0x22   :  { %2378 = vmatmul.mubr.bf16.vlgmr.msra.gmra.mrb[0].mxu1 %v64_v28 }
  0x23   :  { %2382 = vmatpush3.bf16.msra.mxu1 %v2837_v23  ;;  %2418 = vmatmul.mubr.bf16.vlgmr.msra.gmra.mrb[0].mxu0 %v285_v29 }
  0x24   :  { %2422 = vmatpush3.bf16.msra.mxu0 %v2838_v27  ;;  %2383 = vmatprep.subr.bf16.mxu1 %v2839_v30 }
  0x25   :  { %2423 = vmatprep.subr.bf16.mxu0 %v2840_v31  ;;  %2397 = vmatprep.mubr.bf16.mxu1 %v37_v37 }
  0x26   :  { %2437 = vmatprep.mubr.bf16.mxu0 %v412_v38 }
  0x27   :  { %2384 = vmatpush3.bf16.msra.mxu1 %v2839_v30 }
  0x28   :  { %2424 = vmatpush3.bf16.msra.mxu0 %v2840_v31  ;;  %2385 = vmatprep.subr.bf16.mxu1 %v2841_v36 }
  0x29   :  { %2425 = vmatprep.subr.bf16.mxu0 %v2842_v39 }
  0x2b   :  { %2386 = vmatpush3.bf16.msra.mxu1 %v2841_v36 }
  0x2c   :  { %2426 = vmatpush3.bf16.msra.mxu0 %v2842_v39  ;;  %2387 = vmatprep.subr.bf16.mxu1 %v2843_v40 }
  0x2d   :  { %2427 = vmatprep.subr.bf16.mxu0 %v2844_v41 }
  0x2f   :  { %2388 = vmatpush3.bf16.msra.mxu1 %v2843_v40 }
  0x30   :  { %2428 = vmatpush3.bf16.msra.mxu0 %v2844_v41  ;;  %2389 = vmatprep.subr.bf16.mxu1 %v2845_v42 }
  0x31   :  { %2429 = vmatprep.subr.bf16.mxu0 %v2846_v43 }
  0x33   :  { %2390 = vmatpush3.bf16.msra.mxu1 %v2845_v42 }
  0x34   :  { %2430 = vmatpush3.bf16.msra.mxu0 %v2846_v43  ;;  %2391 = vmatprep.subr.bf16.mxu1 %v2847_v44 }
  0x35   :  { %2431 = vmatprep.subr.bf16.mxu0 %v2848_v45 }
  0x37   :  { %2392 = vmatpush3.bf16.msra.mxu1 %v2847_v44 }
  0x38   :  { %2432 = vmatpush3.bf16.msra.mxu0 %v2848_v45  ;;  %2393 = vmatprep.subr.bf16.mxu1 %v2849_v46 }
  0x39   :  { %2433 = vmatprep.subr.bf16.mxu0 %v2850_v47 }
  0x3b   :  { %2394 = vmatpush3.bf16.msra.mxu1 %v2849_v46 }
  0x3c   :  { %2434 = vmatpush3.bf16.msra.mxu0 %v2850_v47  ;;  %2395 = vmatprep.subr.bf16.mxu1 %v2851_v48 }
  0x3d   :  { %2435 = vmatprep.subr.bf16.mxu0 %v2852_v49 }
  0x3f   :  { %2396 = vmatpush3.bf16.msra.mxu1 %v2851_v48 }
  0x40   :  { %2436 = vmatpush3.bf16.msra.mxu0 %v2852_v49  ;;  %2706 = vmatprep.subr.bf16.mxu1 %v2927_v59 }
  0x41   :  { %2730 = vmatprep.subr.bf16.mxu0 %v2927_v59 }
  0x42   :  { %2398 = vmatmul.mubr.bf16.vlgmr.msra.gmra.mrb[0].mxu1 %v38_v56  ;;  %v2856_v56 = vld [vmem:[%s3626_s1 + $0x158] sm:$0xff]  }
  0x43   :  { %2438 = vmatmul.mubr.bf16.vlgmr.msra.gmra.mrb[0].mxu0 %v413_v57  ;;  %2708 = vmatpush3.bf16.msra.mxu1 %v2707_v58  ;;  %v2857_v57 = vld [vmem:[%s3626_s1 + $0x160] sm:$0xff]   ;;  %v2858_v58 = vld [vmem:[%s3626_s1 + $0x168] sm:$0xff]  }
  0x44   :  { %2709 = vmatprep.subr.bf16.mxu1 %v2927_v59  ;;  %2473 = vmatprep.mubr.msk.f32.mxu1 %vm2928_vm0, %v2929_v13 }
  0x45   :  { %2588 = vmatprep.mubr.msk.f32.mxu0 %vm2928_vm0, %v2929_v13 }
  0x47   :  { %2711 = vmatpush3.bf16.msra.mxu1 %v2710_v62 }
  0x48   :  { %2712 = vmatprep.subr.bf16.mxu1 %v2927_v59 }
  0x4b   :  { %2714 = vmatpush3.bf16.msra.mxu1 %v2713_v1 }
  0x4c   :  { %2715 = vmatprep.subr.bf16.mxu1 %v2927_v59 }
  0x4f   :  { %2717 = vmatpush3.bf16.msra.mxu1 %v2716_v4 }
  0x50   :  { %2718 = vmatprep.subr.bf16.mxu1 %v2927_v59 }
  0x53   :  { %2720 = vmatpush3.bf16.msra.mxu1 %v2719_v7  ;;  %v1139_v7 = vld [vmem:[%s3628_s2 + $0x88] sm:$0xff] }
  0x54   :  { %2721 = vmatprep.subr.bf16.mxu1 %v2927_v59 }
  0x57   :  { %2723 = vmatpush3.bf16.msra.mxu1 %v2722_v10  ;;  %v2731_v10 = vpack.c.bf16 %v1139_v7, %v1138_v6  ;;  %v2878_v6 = vld [vmem:[%s3626_s1 + $0x1c8] sm:$0xff]   ;;  %v2879_v7 = vld [vmem:[%s3626_s1 + $0x1d0] sm:$0xff]  }
  0x58   :  { %2724 = vmatprep.subr.bf16.mxu1 %v2927_v59 }
  0x59   :  { %2732 = vmatpush3.bf16.msra.mxu0 %v2731_v10  ;;  %v2882_v10 = vld [vmem:[%s3626_s1 + $0x1e8] sm:$0xff]  }
  0x5a   :  { %2733 = vmatprep.subr.bf16.mxu0 %v2927_v59 }
  0x5b   :  { %2726 = vmatpush3.bf16.msra.mxu1 %v2725_v14 }
  0x5c   :  { %2727 = vmatprep.subr.bf16.mxu1 %v2927_v59 }
  0x5d   :  { %2735 = vmatpush3.bf16.msra.mxu0 %v2734_v12  ;;  %v2884_v12 = vld [vmem:[%s3626_s1 + $0x1f8] sm:$0xff]  }
  0x5e   :  { %2736 = vmatprep.subr.bf16.mxu0 %v2927_v59 }
  0x5f   :  { %2729 = vmatpush3.bf16.msra.mxu1 %v2728_v17  ;;  %v1143_v17 = vld [vmem:[%s3628_s2 + $0xa8] sm:$0xff] }
  0x60   :  { %2476 = vmatprep.subr.bf16.mxu1 %v2929_v13 }
 0x115   :  { %v2399_v18 = vpop.f32.mrb[0].mxu1 }
 0x116   :  { %v2439_v19 = vpop.f32.mrb[0].mxu0  ;;  %v261_v20 = vpop.f32.mrb[1].mxu1 }
 0x117   :  { %v3164_v21 = vadd.f32 %v2439_v19, %v2399_v18  ;;  %v513_v22 = vpop.f32.mrb[1].mxu0  ;;  %v2400_v23 = vpop.f32.mrb[2].mxu1  ;;  %v3241_v19 = vsub.s32 0, %v659_v9  ;;  %v2881_v9 = vld [vmem:[%s3626_s1 + $0x1e0] sm:$0xff]  }
 0x118   :  { %v3166_v24 = vadd.f32 %v513_v22, %v261_v20  ;;  %v2440_v25 = vpop.f32.mrb[2].mxu0  ;;  %v264_v26 = vpop.f32.mrb[3].mxu1  ;;  %v2737_v22 = vpack.c.bf16 %v1143_v17, %v1142_v16  ;;  %v1144_v17 = vld [vmem:[%s3628_s2 + $0xb0] sm:$0xff] }
 0x119   :  { %v3168_v27 = vadd.f32 %v2440_v25, %v2400_v23  ;;  %v516_v28 = vpop.f32.mrb[3].mxu0  ;;  %v559_v33 = vmul.f32 %v3164_v21, %v3164_v21  ;;  %v649_v23 = vld [vmem:[%s3628_s2 + $0x181] sm:$0x1] }
 0x11a   :  { %v3170_v29 = vadd.f32 %v516_v28, %v264_v26  ;;  %v557_v30 = vmul.f32 %v3166_v24, %v3166_v24  ;;  %2738 = vmatpush3.bf16.msra.mxu0 %v2737_v22  ;;  %v1146_v22 = vld [vmem:[%s3628_s2 + $0xc0] sm:$0xff] }
 0x11b   :  { %v560_v36 = vmul.f32 %v3168_v27, %v3168_v27  ;;  %2739 = vmatprep.subr.bf16.mxu0 %v2927_v59 }
 0x11c   :  { %v548_v31 = vadd.f32 %v3170_v29, %v3166_v24  ;;  %v558_v32 = vmul.f32 %v3170_v29, %v3170_v29 }
 0x11e   :  { %v549_v34 = vadd.f32 %v3164_v21, %v548_v31  ;;  %v561_v35 = vadd.f32 %v558_v32, %v557_v30 }
 0x120   :  { %v550_v37 = vadd.f32 %v3168_v27, %v549_v34  ;;  %v562_v38 = vadd.f32 %v561_v35, %v559_v33 }
 0x122   :  { %v551_v39 = vrot.slane %v550_v37, 4  ;;  %v563_v40 = vadd.f32 %v562_v38, %v560_v36 }
 0x124   :  { %v552_v41 = vadd.f32 %v551_v39, %v550_v37  ;;  %v564_v42 = vrot.slane %v563_v40, 4 }
 0x126   :  { %v553_v43 = vrot.slane %v552_v41, 2  ;;  %v565_v44 = vadd.f32 %v564_v42, %v563_v40 }
 0x128   :  { %v554_v45 = vadd.f32 %v553_v43, %v552_v41  ;;  %v566_v46 = vrot.slane %v565_v44, 2 }
 0x12a   :  { %v555_v47 = vrot.slane %v554_v45, 1  ;;  %v567_v48 = vadd.f32 %v566_v46, %v565_v44 }
 0x12c   :  { %v568_v49 = vrot.slane %v567_v48, 1  ;;  %v556_v50 = vadd.f32 %v555_v47, %v554_v45  ;;  %v2861_v45 = vld [vmem:[%s3626_s1 + $0x100] sm:$0xff]   ;;  %v2862_v47 = vld [vmem:[%s3626_s1 + $0x108] sm:$0xff]  }
 0x12e   :  { %v569_v51 = vadd.f32 %v568_v49, %v567_v48  ;;  %v2863_v48 = vld [vmem:[%s3626_s1 + $0x110] sm:$0xff]   ;;  %v2864_v49 = vld [vmem:[%s3626_s1 + $0x118] sm:$0xff]  }
 0x130   :  { %v571_v52 = vsel %vm570_vm1, %v556_v50, %v569_v51  ;;  %v2865_v50 = vld [vmem:[%s3626_s1 + $0x120] sm:$0xff]   ;;  %v2866_v51 = vld [vmem:[%s3626_s1 + $0x128] sm:$0xff]  }
 0x131   :  { %2474 = vmatmul.mubr.f32.vlgmr.msra.gmra.mrb[4].mxu1 %v571_v52  ;;  %v2867_v52 = vld [vmem:[%s3626_s1 + $0x130] sm:$0xff]  }
 0x132   :  { %2492 = vmatprep.mubr.msk.bf16.mxu1 %vm2928_vm0, %v2929_v13  ;;  %2477 = vmatpush3.bf16.msra.mxu1 %v2853_v53  ;;  %v2868_v53 = vld [vmem:[%s3626_s1 + $0x138] sm:$0xff]  }
 0x133   :  { %2478 = vmatprep.subr.bf16.mxu1 %v2929_v13 }
 0x136   :  { %2479 = vmatpush3.bf16.msra.mxu1 %v2854_v54 }
 0x137   :  { %2480 = vmatprep.subr.bf16.mxu1 %v2929_v13 }
 0x13a   :  { %2481 = vmatpush3.bf16.msra.mxu1 %v2855_v55 }
 0x13b   :  { %2482 = vmatprep.subr.bf16.mxu1 %v2929_v13 }
 0x13e   :  { %2483 = vmatpush3.bf16.msra.mxu1 %v2856_v56  ;;  %v2869_v56 = vld [vmem:[%s3626_s1 + $0x180] sm:$0xff]  }
 0x13f   :  { %2484 = vmatprep.subr.bf16.mxu1 %v2929_v13 }
 0x142   :  { %2485 = vmatpush3.bf16.msra.mxu1 %v2857_v57 }
 0x143   :  { %2486 = vmatprep.subr.bf16.mxu1 %v2929_v13 }
 0x146   :  { %2487 = vmatpush3.bf16.msra.mxu1 %v2858_v58  ;;  %v2870_v58 = vld [vmem:[%s3626_s1 + $0x188] sm:$0xff]  }
 0x147   :  { %2488 = vmatprep.subr.bf16.mxu1 %v2929_v13 }
 0x14a   :  { %2489 = vmatpush3.bf16.msra.mxu1 %v2859_v60  ;;  %v2871_v60 = vld [vmem:[%s3626_s1 + $0x190] sm:$0xff]  }
 0x14b   :  { %2490 = vmatprep.subr.bf16.mxu1 %v2929_v13 }
 0x14e   :  { %2491 = vmatpush3.bf16.msra.mxu1 %v2860_v61  ;;  %v2872_v61 = vld [vmem:[%s3626_s1 + $0x198] sm:$0xff]  }
 0x14f   :  { %2496 = vmatprep.subr.bf16.mxu1 %v2929_v13 }
 0x204   :  { %v638_v62 = vpop.f32.mrb[4].mxu1 }
 0x205   :  { %v642_v63 = vmul.f32 %v638_v62, %v638_v62  ;;  %v2475_v0 = vpop.f32.mrb[5].mxu1 }
 0x206   :  { %v2875_v0 = vld [vmem:[%s3626_s1 + $0x1b0] sm:$0xff]  }
 0x207   :  { %v644_v1 = vrot.slane %v642_v63, 7  ;;  %v2874_v63 = vld [vmem:[%s3626_s1 + $0x1a8] sm:$0xff]  }
 0x209   :  { %v646_v2 = vsub.f32 %v638_v62, %v644_v1  ;;  %v2876_v1 = vld [vmem:[%s3626_s1 + $0x1b8] sm:$0xff]  }
 0x20b   :  { %v647_v3 = vmax.f32 %v646_v2, 0.0 }
 0x20d   :  { %v650_v4 = vadd.f32 1e-05, %v647_v3 }
 0x20f   :  { %2917 = vrsqrt.f32 %v650_v4  ;;  %v2877_v4 = vld [vmem:[%s3626_s1 + $0x1c0] sm:$0xff]  }
 0x219   :  { %v2918_v14 = vpop.eup %2917 }
 0x21a   :  { %v653_v18 = vrot.slane %v2918_v14, 1 }
 0x21c   :  { %v655_v20 = vmul.f32 %v653_v18, %v648_v15  ;;  %v1145_v18 = vld [vmem:[%s3628_s2 + $0xb8] sm:$0xff] }
 0x21e   :  { %v656_v25 = vmul.f32 %v655_v20, %v638_v62  ;;  %v661_v26 = vrot.slane %v655_v20, %v3241_v19  ;;  %v2873_v62 = vld [vmem:[%s3626_s1 + $0x1a0] sm:$0xff]   ;;  %v2740_v20 = vpack.c.bf16 %v1145_v18, %v1144_v17  ;;  %v1741_v17 = vld [vmem:[%s3628_s2 + $0x128] sm:$0xff] }
 0x220   :  { %v657_v28 = vsub.f32 %v649_v23, %v656_v25  ;;  %v662_v30 = vmul.f32 %v3166_v24, %v661_v26  ;;  %v663_v31 = vmul.f32 %v3170_v29, %v661_v26  ;;  %v664_v32 = vmul.f32 %v3164_v21, %v661_v26  ;;  %2741 = vmatpush3.bf16.msra.mxu0 %v2740_v20  ;;  %v1147_v23 = vld [vmem:[%s3628_s2 + $0xc8] sm:$0xff]  ;;  %v1248_v20 = vld [vmem:[%s3628_s2 + $0x183] sm:$0x1] }
 0x221   :  { %v665_v33 = vmul.f32 %v3168_v27, %v661_v26  ;;  %2742 = vmatprep.subr.bf16.mxu0 %v2927_v59  ;;  %v2743_v25 = vpack.c.bf16 %v1147_v23, %v1146_v22  ;;  %v1148_v26 = vld [vmem:[%s3628_s2 + $0xd0] sm:$0xff] }
 0x222   :  { %v669_v34 = vrot.slane %v657_v28, %v3241_v19  ;;  %v1149_v28 = vld [vmem:[%s3628_s2 + $0xd8] sm:$0xff] }
 0x224   :  { %v670_v35 = vadd.f32 %v669_v34, %v662_v30  ;;  %v671_v36 = vadd.f32 %v669_v34, %v663_v31  ;;  %v672_v37 = vadd.f32 %v669_v34, %v664_v32  ;;  %v673_v38 = vadd.f32 %v669_v34, %v665_v33  ;;  %2744 = vmatpush3.bf16.msra.mxu0 %v2743_v25  ;;  %v1150_v31 = vld [vmem:[%s3628_s2 + $0xe0] sm:$0xff]  ;;  %v1151_v32 = vld [vmem:[%s3628_s2 + $0xe8] sm:$0xff]  ;;  %v1152_v34 = vld [vmem:[%s3628_s2 + $0xf0] sm:$0xff] }
 0x225   :  { %2745 = vmatprep.subr.bf16.mxu0 %v2927_v59  ;;  %v2746_v30 = vpack.c.bf16 %v1149_v28, %v1148_v26  ;;  %v2749_v33 = vpack.c.bf16 %v1151_v32, %v1150_v31  ;;  %v1742_v26 = vld [vmem:[%s3628_s2 + $0x130] sm:$0xff]  ;;  %v1743_v28 = vld [vmem:[%s3628_s2 + $0x138] sm:$0xff] }
 0x226   :  { %vm674_vm2 = vcmp.ge.f32.partialorder %v670_v35, 0.0  ;;  %vm675_vm3 = vcmp.ge.f32.partialorder %v671_v36, 0.0  ;;  %vm676_vm4 = vcmp.ge.f32.partialorder %v672_v37, 0.0  ;;  %vm677_vm5 = vcmp.ge.f32.partialorder %v673_v38, 0.0 }
 0x227   :  { %v678_v39 = vmul.f32 0.2, %v670_v35  ;;  %v679_v24 = vmul.f32 0.2, %v671_v36  ;;  %v680_v40 = vmul.f32 0.2, %v672_v37 }
 0x228   :  { %v681_v41 = vmul.f32 0.2, %v673_v38  ;;  %2747 = vmatpush3.bf16.msra.mxu0 %v2746_v30 }
 0x229   :  { %v682_v42 = vsel %vm674_vm2, %v670_v35, %v678_v39  ;;  %v683_v29 = vsel %vm675_vm3, %v671_v36, %v679_v24  ;;  %v684_v43 = vsel %vm676_vm4, %v672_v37, %v680_v40  ;;  %2748 = vmatprep.subr.bf16.mxu0 %v2927_v59  ;;  %v1153_v35 = vld [vmem:[%s3628_s2 + $0xf8] sm:$0xff] }
 0x22a   :  { %v685_v21 = vsel %vm677_vm5, %v673_v38, %v681_v41  ;;  %686 = vst [vmem:[#allocation2 + $0x8] sm:$0xff] %v682_v42  ;;  %687 = vst [vmem:[#allocation2 + $0x10] sm:$0xff] %v683_v29  ;;  %v2752_v36 = vpack.c.bf16 %v1153_v35, %v1152_v34 }
 0x22b   :  { %688 = vst [vmem:[#allocation2 + $0x28] sm:$0xff] %v684_v43  ;;  %689 = vst [vmem:[#allocation2 + $0x30] sm:$0xff] %v685_v21 }
 0x22c   :  { %2750 = vmatpush3.bf16.msra.mxu0 %v2749_v33  ;;  %v2764_v33 = vpack.c.bf16 %v1743_v28, %v1742_v26  ;;  %v1748_v28 = vld [vmem:[%s3628_s2 + $0x160] sm:$0xff] }
 0x22d   :  { %2751 = vmatprep.subr.bf16.mxu0 %v2927_v59 }
 0x230   :  { %2753 = vmatpush3.bf16.msra.mxu0 %v2752_v36 }
 0x231   :  { %v713_v27 = vld [vmem:[#allocation2 + $0x8] ss:$2 sm:$0xff]  ;;  %v691_v54 = vld [vmem:[#allocation2 + $0x7] ss:$2 sm:$0xff]  ;;  %2591 = vmatprep.subr.bf16.mxu0 %v2929_v13 }
 0x232   :  { %v715_v44 = vld [vmem:[#allocation2 + $0x28] ss:$2 sm:$0xff]  ;;  %v693_v55 = vld [vmem:[#allocation2 + $0x27] ss:$2 sm:$0xff] }
 0x233   :  { %v716_v46 = vpack.c.bf16 %v715_v44, %v713_v27  ;;  %v694_v57 = vpack.c.bf16 %v693_v55, %v691_v54  ;;  %v913_v2 = vld [vmem:[#allocation2 + $0x9] ss:$2 sm:$0xff]  ;;  %v1026_v14 = vld [vmem:[#allocation2 + $0xa] ss:$2 sm:$0xff]  ;;  %v2885_v54 = vld [vmem:[%s3626_s1 + $0x240] sm:$0xff]  }
 0x234   :  { %v915_v3 = vld [vmem:[#allocation2 + $0x29] ss:$2 sm:$0xff]  ;;  %v1028_v15 = vld [vmem:[#allocation2 + $0x2a] ss:$2 sm:$0xff] }
 0x235   :  { %2493 = vmatmul.mubr.bf16.vlgmr.msra.gmra.mrb[8].mxu1 %v716_v46  ;;  %v916_v5 = vpack.c.bf16 %v915_v3, %v913_v2  ;;  %v1029_v16 = vpack.c.bf16 %v1028_v15, %v1026_v14  ;;  %v2886_v55 = vld [vmem:[%s3626_s1 + $0x248] sm:$0xff]  }
 0x236   :  { %2497 = vmatpush3.bf16.msra.mxu1 %v2861_v45  ;;  %2512 = vmatprep.mubr.msk.bf16.mxu1 %vm2928_vm0, %v2929_v13 }
 0x237   :  { %2498 = vmatprep.subr.bf16.mxu1 %v2929_v13 }
 0x23a   :  { %2499 = vmatpush3.bf16.msra.mxu1 %v2862_v47 }
 0x23b   :  { %2500 = vmatprep.subr.bf16.mxu1 %v2929_v13 }
 0x23e   :  { %2501 = vmatpush3.bf16.msra.mxu1 %v2863_v48 }
 0x23f   :  { %2502 = vmatprep.subr.bf16.mxu1 %v2929_v13 }
 0x242   :  { %2503 = vmatpush3.bf16.msra.mxu1 %v2864_v49 }
 0x243   :  { %2504 = vmatprep.subr.bf16.mxu1 %v2929_v13 }
 0x246   :  { %2505 = vmatpush3.bf16.msra.mxu1 %v2865_v50 }
 0x247   :  { %2506 = vmatprep.subr.bf16.mxu1 %v2929_v13 }
 0x24a   :  { %2507 = vmatpush3.bf16.msra.mxu1 %v2866_v51 }
 0x24b   :  { %2508 = vmatprep.subr.bf16.mxu1 %v2929_v13 }
 0x24e   :  { %2509 = vmatpush3.bf16.msra.mxu1 %v2867_v52 }
 0x24f   :  { %2510 = vmatprep.subr.bf16.mxu1 %v2929_v13 }
 0x252   :  { %2511 = vmatpush3.bf16.msra.mxu1 %v2868_v53 }
 0x253   :  { %2516 = vmatprep.subr.bf16.mxu1 %v2929_v13 }
 0x255   :  { %2513 = vmatmul.mubr.bf16.vlgmr.msra.gmra.mrb[8].mxu1 %v694_v57  ;;  %v2888_v57 = vld [vmem:[%s3626_s1 + $0x258] sm:$0xff]  }
 0x256   :  { %2517 = vmatpush3.bf16.msra.mxu1 %v2869_v56  ;;  %2532 = vmatprep.mubr.msk.bf16.mxu1 %vm2928_vm0, %v2929_v13  ;;  %v2887_v56 = vld [vmem:[%s3626_s1 + $0x250] sm:$0xff]  }
 0x257   :  { %2518 = vmatprep.subr.bf16.mxu1 %v2929_v13 }
 0x25a   :  { %2519 = vmatpush3.bf16.msra.mxu1 %v2870_v58  ;;  %v2889_v58 = vld [vmem:[%s3626_s1 + $0x260] sm:$0xff]  }
 0x25b   :  { %2520 = vmatprep.subr.bf16.mxu1 %v2929_v13 }
 0x25e   :  { %2521 = vmatpush3.bf16.msra.mxu1 %v2871_v60  ;;  %v2890_v60 = vld [vmem:[%s3626_s1 + $0x268] sm:$0xff]  }
 0x25f   :  { %2522 = vmatprep.subr.bf16.mxu1 %v2929_v13 }
 0x262   :  { %2523 = vmatpush3.bf16.msra.mxu1 %v2872_v61  ;;  %v2891_v61 = vld [vmem:[%s3626_s1 + $0x270] sm:$0xff]  }
 0x263   :  { %2524 = vmatprep.subr.bf16.mxu1 %v2929_v13 }
 0x266   :  { %2525 = vmatpush3.bf16.msra.mxu1 %v2873_v62  ;;  %v2892_v62 = vld [vmem:[%s3626_s1 + $0x278] sm:$0xff]  }
 0x267   :  { %2526 = vmatprep.subr.bf16.mxu1 %v2929_v13 }
 0x26a   :  { %2527 = vmatpush3.bf16.msra.mxu1 %v2874_v63 }
 0x26b   :  { %2528 = vmatprep.subr.bf16.mxu1 %v2929_v13 }
 0x26e   :  { %2529 = vmatpush3.bf16.msra.mxu1 %v2875_v0 }
 0x26f   :  { %2530 = vmatprep.subr.bf16.mxu1 %v2929_v13 }
 0x272   :  { %2531 = vmatpush3.bf16.msra.mxu1 %v2876_v1 }
 0x273   :  { %2536 = vmatprep.subr.bf16.mxu1 %v2929_v13 }
 0x275   :  { %2533 = vmatmul.mubr.bf16.vlgmr.msra.gmra.mrb[8].mxu1 %v916_v5 }
 0x276   :  { %2537 = vmatpush3.bf16.msra.mxu1 %v2877_v4  ;;  %2552 = vmatprep.mubr.msk.bf16.mxu1 %vm2928_vm0, %v2929_v13 }
 0x277   :  { %2538 = vmatprep.subr.bf16.mxu1 %v2929_v13 }
 0x27a   :  { %2539 = vmatpush3.bf16.msra.mxu1 %v2878_v6  ;;  %v1736_v6 = vld [vmem:[%s3628_s2 + $0x100] sm:$0xff] }
 0x27b   :  { %2540 = vmatprep.subr.bf16.mxu1 %v2929_v13 }
 0x27e   :  { %2541 = vmatpush3.bf16.msra.mxu1 %v2879_v7  ;;  %v1737_v7 = vld [vmem:[%s3628_s2 + $0x108] sm:$0xff] }
 0x27f   :  { %2542 = vmatprep.subr.bf16.mxu1 %v2929_v13 }
 0x282   :  { %2543 = vmatpush3.bf16.msra.mxu1 %v2880_v8  ;;  %v1738_v8 = vld [vmem:[%s3628_s2 + $0x110] sm:$0xff] }
 0x283   :  { %2544 = vmatprep.subr.bf16.mxu1 %v2929_v13 }
 0x286   :  { %2545 = vmatpush3.bf16.msra.mxu1 %v2881_v9  ;;  %v2755_v9 = vpack.c.bf16 %v1737_v7, %v1736_v6  ;;  %v2910_v6 = vld [vmem:[%s3626_s1 + $0x2c8] sm:$0xff]   ;;  %v2911_v7 = vld [vmem:[%s3626_s1 + $0x2d0] sm:$0xff]  }
 0x287   :  { %2546 = vmatprep.subr.bf16.mxu1 %v2929_v13 }
 0x28a   :  { %2547 = vmatpush3.bf16.msra.mxu1 %v2882_v10  ;;  %v1739_v10 = vld [vmem:[%s3628_s2 + $0x118] sm:$0xff] }
 0x28b   :  { %2548 = vmatprep.subr.bf16.mxu1 %v2929_v13  ;;  %v2758_v14 = vpack.c.bf16 %v1739_v10, %v1738_v8  ;;  %v2912_v8 = vld [vmem:[%s3626_s1 + $0x2d8] sm:$0xff]   ;;  %v2914_v10 = vld [vmem:[%s3626_s1 + $0x2e8] sm:$0xff]  }
 0x28e   :  { %2549 = vmatpush3.bf16.msra.mxu1 %v2883_v11 }
 0x28f   :  { %2550 = vmatprep.subr.bf16.mxu1 %v2929_v13 }
 0x292   :  { %2551 = vmatpush3.bf16.msra.mxu1 %v2884_v12  ;;  %v1247_v12 = vld [vmem:[%s3628_s2 + $0x182] sm:$0x1] }
 0x293   :  { %2754 = vmatprep.subr.bf16.mxu1 %v2927_v59 }
 0x295   :  { %2553 = vmatmul.mubr.bf16.vlgmr.msra.gmra.mrb[8].mxu1 %v1029_v16  ;;  %v1740_v16 = vld [vmem:[%s3628_s2 + $0x120] sm:$0xff] }
 0x296   :  { %2703 = vmatprep.mubr.msk.f32.mxu1 %vm2928_vm0, %v2929_v13  ;;  %2756 = vmatpush3.bf16.msra.mxu1 %v2755_v9  ;;  %v2761_v22 = vpack.c.bf16 %v1741_v17, %v1740_v16  ;;  %v2913_v9 = vld [vmem:[%s3626_s1 + $0x2e0] sm:$0xff]  }
 0x297   :  { %2757 = vmatprep.subr.bf16.mxu1 %v2927_v59 }
 0x29a   :  { %2759 = vmatpush3.bf16.msra.mxu1 %v2758_v14 }
 0x29b   :  { %2760 = vmatprep.subr.bf16.mxu1 %v2927_v59 }
 0x29e   :  { %2762 = vmatpush3.bf16.msra.mxu1 %v2761_v22  ;;  %v1745_v22 = vld [vmem:[%s3628_s2 + $0x148] sm:$0xff] }
 0x29f   :  { %2763 = vmatprep.subr.bf16.mxu1 %v2927_v59 }
 0x2a2   :  { %2765 = vmatpush3.bf16.msra.mxu1 %v2764_v33  ;;  %v1751_v33 = vld [vmem:[%s3628_s2 + $0x178] sm:$0xff] }
 0x2a3   :  { %2766 = vmatprep.subr.bf16.mxu1 %v2927_v59 }
 0x368   :  { %v3393_v37 = vpop.f32.mrb[8].mxu1 }
 0x369   :  { %v2554_v38 = vpop.f32.mrb[9].mxu1  ;;  %v1161_v24 = vmul.f32 %v3393_v37, %v3393_v37 }
 0x36a   :  { %v3395_v39 = vpop.f32.mrb[10].mxu1 }
 0x36b   :  { %v1154_v40 = vadd.f32 %v3395_v39, %v3393_v37  ;;  %v1162_v41 = vmul.f32 %v3395_v39, %v3395_v39  ;;  %v2555_v42 = vpop.f32.mrb[11].mxu1 }
 0x36d   :  { %v1155_v29 = vrot.slane %v1154_v40, 4  ;;  %v1163_v43 = vadd.f32 %v1162_v41, %v1161_v24 }
 0x36f   :  { %v1156_v21 = vadd.f32 %v1155_v29, %v1154_v40  ;;  %v1164_v27 = vrot.slane %v1163_v43, 4 }
 0x371   :  { %v1157_v44 = vrot.slane %v1156_v21, 2  ;;  %v1165_v45 = vadd.f32 %v1164_v27, %v1163_v43  ;;  %v2893_v43 = vld [vmem:[%s3626_s1 + $0x200] sm:$0xff]   ;;  %v2894_v27 = vld [vmem:[%s3626_s1 + $0x208] sm:$0xff]  }
 0x373   :  { %v1158_v46 = vadd.f32 %v1157_v44, %v1156_v21  ;;  %v1166_v47 = vrot.slane %v1165_v45, 2  ;;  %v2895_v44 = vld [vmem:[%s3626_s1 + $0x210] sm:$0xff]  }
 0x375   :  { %v1159_v48 = vrot.slane %v1158_v46, 1  ;;  %v1167_v49 = vadd.f32 %v1166_v47, %v1165_v45  ;;  %v2896_v45 = vld [vmem:[%s3626_s1 + $0x218] sm:$0xff]   ;;  %v2898_v47 = vld [vmem:[%s3626_s1 + $0x228] sm:$0xff]  }
 0x377   :  { %v1168_v50 = vrot.slane %v1167_v49, 1  ;;  %v1160_v51 = vadd.f32 %v1159_v48, %v1158_v46  ;;  %v2897_v46 = vld [vmem:[%s3626_s1 + $0x220] sm:$0xff]  }
 0x379   :  { %v1169_v52 = vadd.f32 %v1168_v50, %v1167_v49  ;;  %v2899_v49 = vld [vmem:[%s3626_s1 + $0x230] sm:$0xff]  }
 0x37b   :  { %v1170_v53 = vsel %vm570_vm1, %v1160_v51, %v1169_v52  ;;  %v2900_v51 = vld [vmem:[%s3626_s1 + $0x238] sm:$0xff]  }
 0x37c   :  { %2589 = vmatmul.mubr.f32.vlgmr.msra.gmra.mrb[4].mxu0 %v1170_v53 }
 0x37d   :  { %2607 = vmatprep.mubr.msk.bf16.mxu0 %vm2928_vm0, %v2929_v13  ;;  %2592 = vmatpush3.bf16.msra.mxu0 %v2885_v54  ;;  %v2901_v54 = vld [vmem:[%s3626_s1 + $0x280] sm:$0xff]  }
 0x37e   :  { %2593 = vmatprep.subr.bf16.mxu0 %v2929_v13 }
 0x381   :  { %2594 = vmatpush3.bf16.msra.mxu0 %v2886_v55 }
 0x382   :  { %2595 = vmatprep.subr.bf16.mxu0 %v2929_v13 }
 0x385   :  { %2596 = vmatpush3.bf16.msra.mxu0 %v2887_v56  ;;  %v2902_v56 = vld [vmem:[%s3626_s1 + $0x288] sm:$0xff]  }
 0x386   :  { %2597 = vmatprep.subr.bf16.mxu0 %v2929_v13 }
 0x389   :  { %2598 = vmatpush3.bf16.msra.mxu0 %v2888_v57  ;;  %v2903_v57 = vld [vmem:[%s3626_s1 + $0x290] sm:$0xff]  }
 0x38a   :  { %2599 = vmatprep.subr.bf16.mxu0 %v2929_v13 }
 0x38d   :  { %2600 = vmatpush3.bf16.msra.mxu0 %v2889_v58  ;;  %v2904_v58 = vld [vmem:[%s3626_s1 + $0x298] sm:$0xff]  }
 0x38e   :  { %2601 = vmatprep.subr.bf16.mxu0 %v2929_v13 }
 0x391   :  { %2602 = vmatpush3.bf16.msra.mxu0 %v2890_v60  ;;  %v2905_v60 = vld [vmem:[%s3626_s1 + $0x2a0] sm:$0xff]  }
 0x392   :  { %2603 = vmatprep.subr.bf16.mxu0 %v2929_v13 }
 0x395   :  { %2604 = vmatpush3.bf16.msra.mxu0 %v2891_v61  ;;  %v2906_v61 = vld [vmem:[%s3626_s1 + $0x2a8] sm:$0xff]  }
 0x396   :  { %2605 = vmatprep.subr.bf16.mxu0 %v2929_v13 }
 0x399   :  { %2606 = vmatpush3.bf16.msra.mxu0 %v2892_v62 }
 0x39a   :  { %2611 = vmatprep.subr.bf16.mxu0 %v2929_v13 }
 0x44f   :  { %v1237_v63 = vpop.f32.mrb[4].mxu0 }
 0x450   :  { %v1241_v0 = vmul.f32 %v1237_v63, %v1237_v63  ;;  %v2590_v1 = vpop.f32.mrb[5].mxu0 }
 0x451   :  { %v2908_v1 = vld [vmem:[%s3626_s1 + $0x2b8] sm:$0xff]  }
 0x452   :  { %v1243_v2 = vrot.slane %v1241_v0, 7 }
 0x454   :  { %v1245_v3 = vsub.f32 %v1237_v63, %v1243_v2 }
 0x456   :  { %v1246_v4 = vmax.f32 %v1245_v3, 0.0 }
 0x458   :  { %v1249_v5 = vadd.f32 1e-05, %v1246_v4  ;;  %v2909_v4 = vld [vmem:[%s3626_s1 + $0x2c0] sm:$0xff]  }
 0x45a   :  { %2919 = vrsqrt.f32 %v1249_v5 }
 0x464   :  { %v2920_v11 = vpop.eup %2919 }
 0x465   :  { %v1252_v15 = vrot.slane %v2920_v11, 1 }
 0x467   :  { %v1254_v18 = vmul.f32 %v1252_v15, %v1247_v12  ;;  %v2915_v12 = vld [vmem:[%s3626_s1 + $0x2f0] sm:$0xff]   ;;  %v2916_v15 = vld [vmem:[%s3626_s1 + $0x2f8] sm:$0xff]  }
 0x469   :  { %v1255_v23 = vmul.f32 %v1254_v18, %v1237_v63  ;;  %v1260_v25 = vrot.slane %v1254_v18, %v3241_v19  ;;  %v2907_v63 = vld [vmem:[%s3626_s1 + $0x2b0] sm:$0xff]  }
 0x46b   :  { %v1256_v30 = vsub.f32 %v1248_v20, %v1255_v23  ;;  %v1261_v31 = vmul.f32 %v1260_v25, %v3393_v37  ;;  %v1262_v32 = vmul.f32 %v1260_v25, %v3395_v39  ;;  %v1744_v20 = vld [vmem:[%s3628_s2 + $0x140] sm:$0xff]  ;;  %v1747_v25 = vld [vmem:[%s3628_s2 + $0x158] sm:$0xff] }
 0x46c   :  { %v2767_v23 = vpack.c.bf16 %v1745_v22, %v1744_v20 }
 0x46d   :  { %v1266_v34 = vrot.slane %v1256_v30, %v3241_v19  ;;  %v1749_v30 = vld [vmem:[%s3628_s2 + $0x168] sm:$0xff] }
 0x46e   :  { %2768 = vmatpush3.bf16.msra.mxu1 %v2767_v23 }
 0x46f   :  { %v1267_v35 = vadd.f32 %v1266_v34, %v1261_v31  ;;  %v1268_v36 = vadd.f32 %v1266_v34, %v1262_v32  ;;  %2769 = vmatprep.subr.bf16.mxu1 %v2927_v59  ;;  %v2773_v31 = vpack.c.bf16 %v1749_v30, %v1748_v28  ;;  %v1750_v32 = vld [vmem:[%s3628_s2 + $0x170] sm:$0xff] }
 0x470   :  { %v2776_v34 = vpack.c.bf16 %v1751_v33, %v1750_v32 }
 0x471   :  { %vm1269_vm6 = vcmp.ge.f32.partialorder %v1267_v35, 0.0  ;;  %vm1270_vm7 = vcmp.ge.f32.partialorder %v1268_v36, 0.0  ;;  %v1271_v38 = vmul.f32 0.2, %v1267_v35  ;;  %v1272_v24 = vmul.f32 0.2, %v1268_v36 }
 0x473   :  { %v1273_v40 = vsel %vm1269_vm6, %v1267_v35, %v1271_v38  ;;  %v1274_v41 = vsel %vm1270_vm7, %v1268_v36, %v1272_v24 }
 0x474   :  { %1275 = vst [vmem:[#allocation3 + $0x8] sm:$0xff] %v1273_v40  ;;  %1276 = vst [vmem:[#allocation3 + $0x20] sm:$0xff] %v1274_v41 }
 0x47b   :  { %v1307_v37 = vld [vmem:[#allocation3 + $0x20] ss:$2 sm:$0xf]  ;;  %v1305_v42 = vld [vmem:[#allocation3 + $0x8] ss:$2 sm:$0xf] }
 0x47c   :  { %v1309_v39 = vrot.slane %v1307_v37, 4  ;;  %v1280_v48 = vld [vmem:[#allocation3 + $0x1f] ss:$2 sm:$0xf] }
 0x47d   :  { %v1282_v50 = vrot.slane %v1280_v48, 4  ;;  %v1278_v52 = vld [vmem:[#allocation3 + $0x7] ss:$2 sm:$0xf] }
 0x47e   :  { %v1311_v29 = vsel %vm1284_vm8, %v1305_v42, %v1309_v39  ;;  %v1509_v62 = vld [vmem:[#allocation3 + $0x21] ss:$2 sm:$0xf]  ;;  %v1507_v2 = vld [vmem:[#allocation3 + $0x9] ss:$2 sm:$0xf] }
 0x47f   :  { %v1312_v21 = vpack.c.bf16 %v1311_v29, %v1311_v29  ;;  %v1285_v53 = vsel %vm1284_vm8, %v1278_v52, %v1282_v50  ;;  %v1511_v0 = vrot.slane %v1509_v62, 4  ;;  %v1624_v11 = vld [vmem:[#allocation3 + $0x22] ss:$2 sm:$0xf] }
 0x480   :  { %v1286_v55 = vpack.c.bf16 %v1285_v53, %v1285_v53  ;;  %v1626_v14 = vrot.slane %v1624_v11, 4  ;;  %v1622_v16 = vld [vmem:[#allocation3 + $0xa] ss:$2 sm:$0xf] }
 0x481   :  { %2608 = vmatmul.mubr.bf16.vlgmr.msra.gmra.mrb[8].mxu0 %v1312_v21  ;;  %v1513_v3 = vsel %vm1284_vm8, %v1507_v2, %v1511_v0  ;;  %v1865_v2 = vld [vmem:[%s3628_s2 + $0x188] sm:$0xf] }
 0x482   :  { %2612 = vmatpush3.bf16.msra.mxu0 %v2893_v43  ;;  %2627 = vmatprep.mubr.msk.bf16.mxu0 %vm2928_vm0, %v2929_v13  ;;  %v1514_v5 = vpack.c.bf16 %v1513_v3, %v1513_v3  ;;  %v1628_v17 = vsel %vm1284_vm8, %v1622_v16, %v1626_v14 }
 0x483   :  { %2613 = vmatprep.subr.bf16.mxu0 %v2929_v13  ;;  %v1629_v18 = vpack.c.bf16 %v1628_v17, %v1628_v17 }
 0x486   :  { %2614 = vmatpush3.bf16.msra.mxu0 %v2894_v27 }
 0x487   :  { %2615 = vmatprep.subr.bf16.mxu0 %v2929_v13 }
 0x48a   :  { %2616 = vmatpush3.bf16.msra.mxu0 %v2895_v44 }
 0x48b   :  { %2617 = vmatprep.subr.bf16.mxu0 %v2929_v13 }
 0x48e   :  { %2618 = vmatpush3.bf16.msra.mxu0 %v2896_v45 }
 0x48f   :  { %2619 = vmatprep.subr.bf16.mxu0 %v2929_v13 }
 0x492   :  { %2620 = vmatpush3.bf16.msra.mxu0 %v2897_v46 }
 0x493   :  { %2621 = vmatprep.subr.bf16.mxu0 %v2929_v13 }
 0x496   :  { %2622 = vmatpush3.bf16.msra.mxu0 %v2898_v47 }
 0x497   :  { %2623 = vmatprep.subr.bf16.mxu0 %v2929_v13 }
 0x49a   :  { %2624 = vmatpush3.bf16.msra.mxu0 %v2899_v49 }
 0x49b   :  { %2625 = vmatprep.subr.bf16.mxu0 %v2929_v13 }
 0x49e   :  { %2626 = vmatpush3.bf16.msra.mxu0 %v2900_v51 }
 0x49f   :  { %2631 = vmatprep.subr.bf16.mxu0 %v2929_v13 }
 0x4a1   :  { %2628 = vmatmul.mubr.bf16.vlgmr.msra.gmra.mrb[8].mxu0 %v1286_v55 }
 0x4a2   :  { %2632 = vmatpush3.bf16.msra.mxu0 %v2901_v54  ;;  %2647 = vmatprep.mubr.msk.bf16.mxu0 %vm2928_vm0, %v2929_v13 }
 0x4a3   :  { %2633 = vmatprep.subr.bf16.mxu0 %v2929_v13 }
 0x4a6   :  { %2634 = vmatpush3.bf16.msra.mxu0 %v2902_v56  ;;  %v1842_v56 = vld [vmem:[%s3628_s2 + $0x184] sm:$0x1] }
 0x4a7   :  { %2635 = vmatprep.subr.bf16.mxu0 %v2929_v13 }
 0x4aa   :  { %2636 = vmatpush3.bf16.msra.mxu0 %v2903_v57 }
 0x4ab   :  { %2637 = vmatprep.subr.bf16.mxu0 %v2929_v13 }
 0x4ae   :  { %2638 = vmatpush3.bf16.msra.mxu0 %v2904_v58 }
 0x4af   :  { %2639 = vmatprep.subr.bf16.mxu0 %v2929_v13 }
 0x4b2   :  { %2640 = vmatpush3.bf16.msra.mxu0 %v2905_v60  ;;  %v1843_v60 = vld [vmem:[%s3628_s2 + $0x185] sm:$0x1] }
 0x4b3   :  { %2641 = vmatprep.subr.bf16.mxu0 %v2929_v13 }
 0x4b6   :  { %2642 = vmatpush3.bf16.msra.mxu0 %v2906_v61 }
 0x4b7   :  { %2643 = vmatprep.subr.bf16.mxu0 %v2929_v13 }
 0x4ba   :  { %2644 = vmatpush3.bf16.msra.mxu0 %v2907_v63 }
 0x4bb   :  { %2645 = vmatprep.subr.bf16.mxu0 %v2929_v13 }
 0x4be   :  { %2646 = vmatpush3.bf16.msra.mxu0 %v2908_v1 }
 0x4bf   :  { %2651 = vmatprep.subr.bf16.mxu0 %v2929_v13 }
 0x4c1   :  { %2648 = vmatmul.mubr.bf16.vlgmr.msra.gmra.mrb[8].mxu0 %v1514_v5 }
 0x4c2   :  { %2652 = vmatpush3.bf16.msra.mxu0 %v2909_v4  ;;  %2667 = vmatprep.mubr.msk.bf16.mxu0 %vm2928_vm0, %v2929_v13  ;;  %v1879_v4 = vrot.slane %v1865_v2, 4 }
 0x4c3   :  { %2653 = vmatprep.subr.bf16.mxu0 %v2929_v13 }
 0x4c6   :  { %2654 = vmatpush3.bf16.msra.mxu0 %v2910_v6 }
 0x4c7   :  { %2655 = vmatprep.subr.bf16.mxu0 %v2929_v13 }
 0x4ca   :  { %2656 = vmatpush3.bf16.msra.mxu0 %v2911_v7 }
 0x4cb   :  { %2657 = vmatprep.subr.bf16.mxu0 %v2929_v13 }
 0x4ce   :  { %2658 = vmatpush3.bf16.msra.mxu0 %v2912_v8 }
 0x4cf   :  { %2659 = vmatprep.subr.bf16.mxu0 %v2929_v13 }
 0x4d2   :  { %2660 = vmatpush3.bf16.msra.mxu0 %v2913_v9 }
 0x4d3   :  { %2661 = vmatprep.subr.bf16.mxu0 %v2929_v13 }
 0x4d6   :  { %2662 = vmatpush3.bf16.msra.mxu0 %v2914_v10 }
 0x4d7   :  { %2663 = vmatprep.subr.bf16.mxu0 %v2929_v13 }
 0x4da   :  { %2664 = vmatpush3.bf16.msra.mxu0 %v2915_v12 }
 0x4db   :  { %2665 = vmatprep.subr.bf16.mxu0 %v2929_v13  ;;  %v1746_v13 = vld [vmem:[%s3628_s2 + $0x150] sm:$0xff] }
 0x4dc   :  { %v2770_v26 = vpack.c.bf16 %v1747_v25, %v1746_v13 }
 0x4de   :  { %2666 = vmatpush3.bf16.msra.mxu0 %v2916_v15  ;;  %2771 = vmatpush3.bf16.msra.mxu1 %v2770_v26 }
 0x4df   :  { %2772 = vmatprep.subr.bf16.mxu1 %v2927_v59 }
 0x4e1   :  { %2668 = vmatmul.mubr.bf16.vlgmr.msra.gmra.mrb[8].mxu0 %v1629_v18 }
 0x4e2   :  { %2774 = vmatpush3.bf16.msra.mxu1 %v2773_v31 }
 0x4e3   :  { %2775 = vmatprep.subr.bf16.mxu1 %v2927_v59 }
 0x4e6   :  { %2777 = vmatpush3.bf16.msra.mxu1 %v2776_v34 }
 0x5b4   :  { %v1729_v35 = vpop.f32.mrb[8].mxu0 }
 0x5b5   :  { %v1752_v36 = vrot.slane %v1729_v35, 4  ;;  %v1758_v38 = vmul.f32 %v1729_v35, %v1729_v35  ;;  %v2669_v24 = vpop.f32.mrb[9].mxu0 }
 0x5b6   :  { %v1732_v40 = vpop.f32.mrb[10].mxu0 }
 0x5b7   :  { %v1753_v41 = vadd.f32 %v1752_v36, %v1729_v35  ;;  %v1759_v37 = vrot.slane %v1758_v38, 4  ;;  %v2670_v39 = vpop.f32.mrb[11].mxu0 }
 0x5b9   :  { %v1754_v42 = vrot.slane %v1753_v41, 2  ;;  %v1760_v29 = vadd.f32 %v1759_v37, %v1758_v38 }
 0x5bb   :  { %v1755_v43 = vadd.f32 %v1754_v42, %v1753_v41  ;;  %v1761_v21 = vrot.slane %v1760_v29, 2 }
 0x5bd   :  { %v1756_v27 = vrot.slane %v1755_v43, 1  ;;  %v1762_v44 = vadd.f32 %v1761_v21, %v1760_v29 }
 0x5bf   :  { %v1763_v45 = vrot.slane %v1762_v44, 1  ;;  %v1757_v46 = vadd.f32 %v1756_v27, %v1755_v43 }
 0x5c1   :  { %v1764_v47 = vadd.f32 %v1763_v45, %v1762_v44 }
 0x5c3   :  { %v1765_v59 = vsel %vm570_vm1, %v1757_v46, %v1764_v47 }
 0x5c4   :  { %2704 = vmatmul.mubr.f32.vlgmr.msra.gmra.mrb[6].mxu1 %v1765_v59 }
 0x697   :  { %v1832_v48 = vpop.f32.mrb[6].mxu1 }
 0x698   :  { %v1836_v49 = vmul.f32 %v1832_v48, %v1832_v48  ;;  %v2705_v50 = vpop.f32.mrb[7].mxu1 }
 0x69a   :  { %v1838_v51 = vrot.slane %v1836_v49, 7 }
 0x69c   :  { %v1840_v52 = vsub.f32 %v1832_v48, %v1838_v51 }
 0x69e   :  { %v1841_v53 = vmax.f32 %v1840_v52, 0.0 }
 0x6a0   :  { %v1844_v54 = vadd.f32 1e-05, %v1841_v53 }
 0x6a2   :  { %2921 = vrsqrt.f32 %v1844_v54 }
 0x6ac   :  { %v2922_v55 = vpop.eup %2921 }
 0x6ad   :  { %v1847_v57 = vrot.slane %v2922_v55, 1 }
 0x6af   :  { %v1849_v58 = vmul.f32 %v1847_v57, %v1842_v56 }
 0x6b1   :  { %v1850_v61 = vmul.f32 %v1849_v58, %v1832_v48  ;;  %v1855_v62 = vrot.slane %v1849_v58, %v3241_v19 }
 0x6b3   :  { %v1851_v63 = vsub.f32 %v1843_v60, %v1850_v61  ;;  %v1856_v0 = vmul.f32 %v1855_v62, %v1729_v35 }
 0x6b5   :  { %v1860_v1 = vrot.slane %v1851_v63, %v3241_v19 }
 0x6b7   :  { %v1861_v3 = vadd.f32 %v1860_v1, %v1856_v0 }
 0x6b9   :  { %vm1862_vm9 = vcmp.ge.f32.partialorder %v1861_v3, 0.0  ;;  %v1863_v5 = vmul.f32 0.2, %v1861_v3 }
 0x6bb   :  { %v1864_v6 = vsel %vm1862_vm9, %v1861_v3, %v1863_v5 }
 0x6bc   :  { %v1866_v7 = vmul.f32 %v1865_v2, %v1864_v6  ;;  %v1881_v8 = vmul.f32 %v1879_v4, %v1864_v6 }
 0x6be   :  { %v1867_v9 = vsel %vm1284_vm8, %v1866_v7, 0.0  ;;  %v1883_v10 = vrot.slane %v1881_v8, 4 }
 0x6bf   :  { %1868 = vadd.xlane.f32.xlu0 %v1867_v9 }
 0x6c0   :  { %v1885_v11 = vsel %vm1284_vm8, %v1883_v10, 0.0 }
 0x6c3   :  { %1886 = vadd.xlane.f32.xlu0 %v1885_v11 }
 0x74c   :  { %v1869_v12 = vpop.xlane.xlu0 %1868 }
 0x74d   :  { %v1870_v19 = vrot.slane %v1869_v12, 4 }
 0x74f   :  { %v1871_v14 = vadd.f32 %v1870_v19, %v1869_v12 }
 0x750   :  { %v1887_v15 = vpop.xlane.xlu0 %1886 }
 0x751   :  { %v1872_v16 = vrot.slane %v1871_v14, 2  ;;  %v1888_v17 = vrot.slane %v1887_v15, 4 }
 0x753   :  { %v1889_v18 = vadd.f32 %v1888_v17, %v1887_v15  ;;  %v1873_v20 = vadd.f32 %v1872_v16, %v1871_v14 }
 0x755   :  { %v1890_v22 = vrot.slane %v1889_v18, 2  ;;  %v1874_v23 = vrot.slane %v1873_v20, 1 }
 0x757   :  { %v1891_v13 = vadd.f32 %v1890_v22, %v1889_v18  ;;  %v1875_v25 = vadd.f32 %v1874_v23, %v1873_v20 }
 0x759   :  { %2814 = vpush %v1875_v25  ;;  %v1892_v26 = vrot.slane %v1891_v13, 1 }
 0x75b   :  { %v1893_v28 = vadd.f32 %v1892_v26, %v1891_v13 }
 0x75d   :  { %2816 = vpush %v1893_v28 }
 0x78a   :  { %s2815_s2 = spop %2814 }
 0x78b   :  { %v1877_v30 = vstv %s2815_s2 }
 0x78e   :  { %s2817_s12 = spop %2816 }
 0x78f   :  { %v1895_v31 = vstv %s2817_s12 }
 0x790   :  { %v1896_v32 = vsel %vm570_vm1, %v1877_v30, %v1895_v31 }
 0x791   :  { %v2197_v33 = vmul.f32 -1.442695, %v1896_v32 }
 0x793   :  { %2923 = vpow2.f32 %v2197_v33 }
 0x79d   :  { %v2924_v34 = vpop.eup %2923 }
 0x79e   :  { %v1900_v35 = vadd.f32 1.0, %v2924_v34 }
 0x7a0   :  { %2925 = vrcp.f32 %v1900_v35 }
 0x7aa   :  { %v2926_v36 = vpop.eup %2925 }
 0x7ab   :  { %1904 = vst.msk [vmem:[%s3629_s3] sm:$0x3] %vm1903_vm10, %v2926_v36 }

</bundles_post_ra>
